<compile_context>
chip_gen: v6e
topology: v6e:2x2x1
jax: 0.10.0
libtpu: 0.0.40
codegen_flags: <defaults>
</compile_context>

<pallas_src>
import jax
import jax.numpy as jnp
from jax.experimental import pallas as pl
from jax.experimental.pallas import tpu as pltpu

LANE = 128


def _round_up(n, m):
    return ((n + m - 1) // m) * m


def _pick_query_tile(s):
    """Largest power-of-two query tile (<=512) that divides S with >=2 tiles."""
    if s % 8 != 0:
        return s
    for cand in (512, 256, 128, 64, 32, 16, 8):
        if s % cand == 0 and s // cand >= 2:
            return cand
    return s


def _bilinear_align_corners(gm, out_h, out_w):
    """F.interpolate(..., mode='bilinear', align_corners=True) in plain JAX."""
    _, _, hg, wg = gm.shape

    def coords(out_n, in_n):
        if out_n == 1 or in_n == 1:
            src = jnp.zeros((out_n,), jnp.float32)
        else:
            src = jnp.arange(out_n, dtype=jnp.float32) * ((in_n - 1) / (out_n - 1))
        i0 = jnp.clip(jnp.floor(src).astype(jnp.int32), 0, in_n - 1)
        i1 = jnp.minimum(i0 + 1, in_n - 1)
        frac = (src - i0.astype(jnp.float32)).astype(gm.dtype)
        return i0, i1, frac

    y0, y1, fy = coords(out_h, hg)
    x0, x1, fx = coords(out_w, wg)
    g_y0 = gm[:, :, y0, :]
    g_y1 = gm[:, :, y1, :]
    fy = fy[None, None, :, None]
    fx = fx[None, None, None, :]
    top = g_y0[:, :, :, x0] * (1.0 - fx) + g_y0[:, :, :, x1] * fx
    bot = g_y1[:, :, :, x0] * (1.0 - fx) + g_y1[:, :, :, x1] * fx
    return top * (1.0 - fy) + bot * fy


def change_guide_module(x, guiding_map0, wq, bq, wk, bk, wv, bv, gamma):
    """Forward pass of ChangeGuideModule.

    x: (B, C, H, W) float32 (NCHW), guiding_map0: (B, 1, Hg, Wg),
    wq/wk: (C//8, C, 1, 1), bq/bk: (C//8,), wv: (C, C, 1, 1), bv: (C,),
    gamma: scalar / shape-(1,) parameter.
    """
    B, C, H, W = x.shape
    Cq = wq.shape[0]
    S = H * W

    # Padded channel dims: +1 lane for the folded bias / "ones" column.
    Cp = _round_up(C + 1, LANE)
    Cqp = _round_up(Cq, LANE)
    TQ = _pick_query_tile(S)
    NQT = S // TQ
    WCOLS = 2 * Cqp + Cp

    # ---- wrapper glue: guiding map resize + sigmoid, NCHW -> (B, S, *) ----
    g = jax.nn.sigmoid(_bilinear_align_corners(guiding_map0.astype(jnp.float32), H, W))
    gmul = (1.0 + g).transpose(0, 2, 3, 1).reshape(B, S, 1).astype(jnp.float32)
    x_flat = jnp.transpose(x, (0, 2, 3, 1)).reshape(B, S, C).astype(jnp.float32)
    # Augment with a ones lane at index C (bias fold), zero-pad the rest.
    x_p = jnp.concatenate(
        [x_flat,
         jnp.ones((B, S, 1), jnp.float32),
         jnp.zeros((B, S, Cp - C - 1), jnp.float32)], axis=-1)

    gval = jnp.asarray(gamma, jnp.float32).reshape(())

    def aug_weight(w2, b, out_cols):
        # w2: (C, Co), b: (Co,) -> (Cp, out_cols) with bias in row C.
        m = jnp.zeros((Cp, out_cols), jnp.float32)
        m = m.at[:C, :w2.shape[1]].set(w2)
        m = m.at[C, :w2.shape[1]].set(b)
        return m

    wq_m = aug_weight(wq[:, :, 0, 0].T, bq, Cqp)
    wk_m = aug_weight(wk[:, :, 0, 0].T, bk, Cqp)
    wv_m = aug_weight(wv[:, :, 0, 0].T * gval, bv * gval, Cp)   # gamma folded in
    w_all = jnp.concatenate([wq_m, wk_m, wv_m], axis=1).astype(jnp.bfloat16)

    # ---- explicit VMEM budget (double-buffered blocks + scratch + temps) ----
    footprint = (2 * S * Cp * 4          # x block (double-buffered)
                 + 2 * S * LANE * 4      # gate block (lane-padded, conservative)
                 + 2 * Cp * WCOLS * 2    # combined weight
                 + 2 * TQ * Cp * 4       # output block
                 + S * WCOLS * 2         # q/k/v bf16 scratch
                 + S * WCOLS * 4         # one-shot f32 projection temp
                 + 2 * TQ * S * 4)       # energy / probs temp (+ slack)
    vmem_limit = int(max(32 << 20, min(96 << 20, footprint * 5 // 4 + (4 << 20))))

    def kernel(x_ref, g_ref, w_ref, o_ref, q_sc, k_sc, v_sc):
        qi = pl.program_id(1)

        # Per-image projections, computed once (first query tile of each image).
        @pl.when(qi == 0)
        def _():
            # Gate fold: lane C of x is 1.0  =>  (x*g) @ W_aug == (x@W + b) * g.
            xg = (x_ref[0] * g_ref[0]).astype(jnp.bfloat16)            # (S, Cp)
            proj = jnp.dot(xg, w_ref[...],
                           preferred_element_type=jnp.float32)         # (S, WCOLS)
            q_sc[...] = proj[:, :Cqp].astype(jnp.bfloat16)
            k_sc[...] = proj[:, Cqp:2 * Cqp].astype(jnp.bfloat16)
            v_sc[...] = proj[:, 2 * Cqp:].astype(jnp.bfloat16)         # gamma*V

        row0 = pl.multiple_of(qi * TQ, TQ)
        q_tile = q_sc[pl.ds(row0, TQ), :]                              # (TQ, Cqp) bf16
        # energy[t, s] = <q_t, k_s>  (bf16 operands, f32 accumulate)
        e = jax.lax.dot_general(q_tile, k_sc[...],
                                dimension_numbers=(((1,), (1,)), ((), ())),
                                preferred_element_type=jnp.float32)    # (TQ, S)
        # Numerically stable softmax, single live (TQ, S) temp, un-normalized.
        e = e - jnp.max(e, axis=-1, keepdims=True)
        p = jnp.exp(e)
        l = jnp.sum(p, axis=-1, keepdims=True)
        av = jnp.dot(p.astype(jnp.bfloat16), v_sc[...],
                     preferred_element_type=jnp.float32)               # (TQ, Cp)
        x_tile = x_ref[0, pl.ds(row0, TQ), :]                          # f32 residual
        o_ref[0] = (av * pl.reciprocal(l, approx=True) + x_tile).astype(o_ref.dtype)

    out = pl.pallas_call(
        kernel,
        out_shape=jax.ShapeDtypeStruct((B, S, Cp), jnp.float32),
        grid_spec=pltpu.PrefetchScalarGridSpec(
            num_scalar_prefetch=0,
            grid=(B, NQT),
            in_specs=[
                pl.BlockSpec((1, S, Cp), lambda b, q: (b, 0, 0)),      # x (augmented)
                pl.BlockSpec((1, S, 1), lambda b, q: (b, 0, 0)),       # 1 + sigmoid(g)
                pl.BlockSpec((Cp, WCOLS), lambda b, q: (0, 0)),        # Wq|Wk|gamma*Wv
            ],
            out_specs=pl.BlockSpec((1, TQ, Cp), lambda b, q: (b, q, 0)),
            scratch_shapes=[
                pltpu.VMEM((S, Cqp), jnp.bfloat16),                    # Q
                pltpu.VMEM((S, Cqp), jnp.bfloat16),                    # K
                pltpu.VMEM((S, Cp), jnp.bfloat16),                     # gamma*V
            ],
        ),
        compiler_params=pltpu.CompilerParams(
            dimension_semantics=("parallel", "arbitrary"),
            vmem_limit_bytes=vmem_limit,
        ),
    )(x_p, gmul, w_all)

    out = out[:, :, :C].reshape(B, H, W, C)
    return jnp.transpose(out, (0, 3, 1, 2))                            # back to NCHW


def _reference(x, guiding_map0, wq, bq, wk, bk, wv, bv, gamma):
    """Pure-JAX re-implementation of the PyTorch forward (f32, highest precision)."""
    B, C, H, W = x.shape
    hp = jax.lax.Precision.HIGHEST
    g = jax.nn.sigmoid(_bilinear_align_corners(guiding_map0, H, W))

    def conv1x1(inp, w, b):
        y = jnp.einsum('bchw,oc->bohw', inp, w[:, :, 0, 0], precision=hp)
        return y + b[None, :, None, None]

    q = conv1x1(x, wq, bq) * (1.0 + g)
    k = conv1x1(x, wk, bk) * (1.0 + g)
    v = conv1x1(x, wv, bv) * (1.0 + g)
    S = H * W
    pq = q.reshape(B, -1, S).transpose(0, 2, 1)           # (B, S, Cq)
    pk = k.reshape(B, -1, S)                               # (B, Cq, S)
    energy = jnp.einsum('bsc,bct->bst', pq, pk, precision=hp)
    attn = jax.nn.softmax(energy, axis=-1)
    pv = v.reshape(B, -1, S)                               # (B, C, S)
    out = jnp.einsum('bcs,bts->bct', pv, attn, precision=hp)
    out = out.reshape(B, C, H, W)
    gval = jnp.asarray(gamma, jnp.float32).reshape(())
    return gval * out + x


if __name__ == "__main__":
    # ChangeGuideModule(in_dim=32): query/key project to 32//8 = 4 channels.
    B, C, H, W = 2, 32, 16, 16
    Hg, Wg = 8, 8                      # low-res guiding map, upsampled in forward
    Cq = C // 8

    key = jax.random.PRNGKey(0)
    kx, kg0, k1, k2, k3, k4, k5, k6 = jax.random.split(key, 8)

    x = jax.random.normal(kx, (B, C, H, W), dtype=jnp.float32)
    guiding_map0 = jax.random.normal(kg0, (B, 1, Hg, Wg), dtype=jnp.float32)

    wq = jax.random.normal(k1, (Cq, C, 1, 1), dtype=jnp.float32) * 0.1
    bq = jax.random.normal(k2, (Cq,), dtype=jnp.float32) * 0.1
    wk = jax.random.normal(k3, (Cq, C, 1, 1), dtype=jnp.float32) * 0.1
    bk = jax.random.normal(k4, (Cq,), dtype=jnp.float32) * 0.1
    wv = jax.random.normal(k5, (C, C, 1, 1), dtype=jnp.float32) * 0.1
    bv = jax.random.normal(k6, (C,), dtype=jnp.float32) * 0.1
    # nn.Parameter(torch.zeros(1)) initializes gamma to 0 (output == x);
    # use a nonzero value so the attention path is actually exercised.
    gamma = jnp.asarray([0.5], dtype=jnp.float32)

    out = change_guide_module(x, guiding_map0, wq, bq, wk, bk, wv, bv, gamma)
    out = jax.block_until_ready(out)

    ref = _reference(x, guiding_map0, wq, bq, wk, bk, wv, bv, gamma)
    assert out.shape == (B, C, H, W)
    err = float(jnp.max(jnp.abs(out - ref)))
    # bf16 MXU operands (f32 accumulate) -> tolerance widened vs pure-f32 ref.
    assert jnp.allclose(out, ref, atol=3e-2, rtol=3e-2), f"mismatch, max err {err}"
    print("KERNEL_OK")
</pallas_src>

<mosaic_0001>
module attributes {stable_mosaic.version = 11 : i64} {
  func.func @kernel(%arg0: i32, %arg1: i32, %arg2: memref<1x256x128xf32, #tpu.memory_space<vmem>>, %arg3: memref<1x256x1xf32, #tpu.memory_space<vmem>>, %arg4: memref<128x384xbf16, #tpu.memory_space<vmem>>, %arg5: memref<1x128x128xf32, #tpu.memory_space<vmem>>, %arg6: memref<256x128xbf16, #tpu.memory_space<vmem>>, %arg7: memref<256x128xbf16, #tpu.memory_space<vmem>>, %arg8: memref<256x128xbf16, #tpu.memory_space<vmem>>) attributes {dimension_semantics = [#tpu.dimension_semantics<parallel>, #tpu.dimension_semantics<arbitrary>], iteration_bounds = array<i64: 2, 2>, scalar_prefetch = 0 : i64, scratch_operands = 3 : i64, tpu.core_type = #tpu.core_type<tc>, window_params = [{transform_indices = @transform_0, window_bounds = array<i64: 1, 256, 128>}, {transform_indices = @transform_1, window_bounds = array<i64: 1, 256, 1>}, {pipeline_mode = #tpu.pipeline_mode<synchronous>, transform_indices = @transform_2, window_bounds = array<i64: 128, 384>}, {transform_indices = @transform_3, window_bounds = array<i64: 1, 128, 128>}]} {
    %c0_i32 = arith.constant 0 : i32
    %0 = arith.cmpi eq, %arg1, %c0_i32 : i32
    %1 = arith.extui %0 : i1 to i32
    %c0_i32_0 = arith.constant 0 : i32
    %2 = arith.cmpi ne, %1, %c0_i32_0 : i32
    scf.if %2 {
      %c0_13 = arith.constant 0 : index
      %c0_14 = arith.constant 0 : index
      %c0_15 = arith.constant 0 : index
      %29 = vector.load %arg2[%c0_13, %c0_14, %c0_15] : memref<1x256x128xf32, #tpu.memory_space<vmem>>, vector<1x256x128xf32>
      %30 = vector.shape_cast %29 : vector<1x256x128xf32> to vector<256x128xf32>
      %c0_16 = arith.constant 0 : index
      %c0_17 = arith.constant 0 : index
      %c0_18 = arith.constant 0 : index
      %31 = vector.load %arg3[%c0_16, %c0_17, %c0_18] : memref<1x256x1xf32, #tpu.memory_space<vmem>>, vector<1x256x1xf32>
      %32 = vector.shape_cast %31 : vector<1x256x1xf32> to vector<256x1xf32>
      %33 = vector.broadcast %32 : vector<256x1xf32> to vector<256x128xf32>
      %34 = arith.mulf %30, %33 : vector<256x128xf32>
      %35 = arith.truncf %34 : vector<256x128xf32> to vector<256x128xbf16>
      %c0_19 = arith.constant 0 : index
      %c0_20 = arith.constant 0 : index
      %36 = vector.load %arg4[%c0_19, %c0_20] : memref<128x384xbf16, #tpu.memory_space<vmem>>, vector<128x384xbf16>
      %cst_21 = arith.constant dense<0.000000e+00> : vector<256x384xf32>
      %37 = tpu.matmul %35, %36, %cst_21 {dimension_numbers = #tpu.dot_dimension_numbers<[1], [0], [0], [1], [0, 0, 1, 1], [], []>} : vector<256x128xbf16>, vector<128x384xbf16>, vector<256x384xf32> -> vector<256x384xf32>
      %38 = vector.extract_strided_slice %37 {offsets = [0, 0], sizes = [256, 128], strides = [1, 1]} : vector<256x384xf32> to vector<256x128xf32>
      %39 = arith.truncf %38 : vector<256x128xf32> to vector<256x128xbf16>
      %c0_22 = arith.constant 0 : index
      %c0_23 = arith.constant 0 : index
      %40 = vector.load %arg6[%c0_22, %c0_23] : memref<256x128xbf16, #tpu.memory_space<vmem>>, vector<256x128xbf16>
      tpu.vector_store %arg6[%c0_22, %c0_23], %39 {strides = array<i32>} : memref<256x128xbf16, #tpu.memory_space<vmem>>, vector<256x128xbf16>,
      %41 = vector.extract_strided_slice %37 {offsets = [0, 128], sizes = [256, 128], strides = [1, 1]} : vector<256x384xf32> to vector<256x128xf32>
      %42 = arith.truncf %41 : vector<256x128xf32> to vector<256x128xbf16>
      %c0_24 = arith.constant 0 : index
      %c0_25 = arith.constant 0 : index
      %43 = vector.load %arg7[%c0_24, %c0_25] : memref<256x128xbf16, #tpu.memory_space<vmem>>, vector<256x128xbf16>
      tpu.vector_store %arg7[%c0_24, %c0_25], %42 {strides = array<i32>} : memref<256x128xbf16, #tpu.memory_space<vmem>>, vector<256x128xbf16>,
      %44 = vector.extract_strided_slice %37 {offsets = [0, 256], sizes = [256, 128], strides = [1, 1]} : vector<256x384xf32> to vector<256x128xf32>
      %45 = arith.truncf %44 : vector<256x128xf32> to vector<256x128xbf16>
      %c0_26 = arith.constant 0 : index
      %c0_27 = arith.constant 0 : index
      %46 = vector.load %arg8[%c0_26, %c0_27] : memref<256x128xbf16, #tpu.memory_space<vmem>>, vector<256x128xbf16>
      tpu.vector_store %arg8[%c0_26, %c0_27], %45 {strides = array<i32>} : memref<256x128xbf16, #tpu.memory_space<vmem>>, vector<256x128xbf16>,
    } else {
    }
    %c128_i32 = arith.constant 128 : i32
    %3 = arith.muli %arg1, %c128_i32 : i32
    %4 = tpu.assume_multiple %3, 128 : i32
    %5 = arith.index_cast %4 : i32 to index
    %c0 = arith.constant 0 : index
    %6 = vector.load %arg6[%5, %c0] : memref<256x128xbf16, #tpu.memory_space<vmem>>, vector<128x128xbf16>
    %c0_1 = arith.constant 0 : index
    %c0_2 = arith.constant 0 : index
    %7 = vector.load %arg7[%c0_1, %c0_2] : memref<256x128xbf16, #tpu.memory_space<vmem>>, vector<256x128xbf16>
    %cst = arith.constant dense<0.000000e+00> : vector<128x256xf32>
    %8 = tpu.matmul %6, %7, %cst {dimension_numbers = #tpu.dot_dimension_numbers<[1], [1], [0], [0], [0, 0, 1, 0], [], []>} : vector<128x128xbf16>, vector<256x128xbf16>, vector<128x256xf32> -> vector<128x256xf32>
    %cst_3 = arith.constant dense<0xFF800000> : vector<128xf32>
    %9 = vector.multi_reduction <maximumf>, %8, %cst_3 [1] : vector<128x256xf32> to vector<128xf32>
    %10 = vector.shape_cast %9 : vector<128xf32> to vector<128x1xf32>
    %11 = vector.broadcast %10 : vector<128x1xf32> to vector<128x256xf32>
    %12 = arith.subf %8, %11 : vector<128x256xf32>
    %13 = math.exp %12 : vector<128x256xf32>
    %cst_4 = arith.constant dense<0.000000e+00> : vector<128xf32>
    %14 = vector.multi_reduction <add>, %13, %cst_4 [1] : vector<128x256xf32> to vector<128xf32>
    %15 = vector.shape_cast %14 : vector<128xf32> to vector<128x1xf32>
    %16 = arith.truncf %13 : vector<128x256xf32> to vector<128x256xbf16>
    %c0_5 = arith.constant 0 : index
    %c0_6 = arith.constant 0 : index
    %17 = vector.load %arg8[%c0_5, %c0_6] : memref<256x128xbf16, #tpu.memory_space<vmem>>, vector<256x128xbf16>
    %cst_7 = arith.constant dense<0.000000e+00> : vector<128x128xf32>
    %18 = tpu.matmul %16, %17, %cst_7 {dimension_numbers = #tpu.dot_dimension_numbers<[1], [0], [0], [1], [0, 0, 1, 1], [], []>} : vector<128x256xbf16>, vector<256x128xbf16>, vector<128x128xf32> -> vector<128x128xf32>
    %c0_8 = arith.constant 0 : index
    %19 = arith.index_cast %4 : i32 to index
    %c0_9 = arith.constant 0 : index
    %20 = vector.load %arg2[%c0_8, %19, %c0_9] : memref<1x256x128xf32, #tpu.memory_space<vmem>>, vector<1x128x128xf32>
    %21 = vector.shape_cast %20 : vector<1x128x128xf32> to vector<128x128xf32>
    %22 = tpu.reciprocal %15 {approx = true} : vector<128x1xf32> -> vector<128x1xf32>
    %23 = vector.broadcast %22 : vector<128x1xf32> to vector<128x128xf32>
    %24 = arith.mulf %18, %23 : vector<128x128xf32>
    %25 = arith.addf %24, %21 : vector<128x128xf32>
    %c0_10 = arith.constant 0 : index
    %c0_11 = arith.constant 0 : index
    %c0_12 = arith.constant 0 : index
    %26 = vector.load %arg5[%c0_10, %c0_11, %c0_12] : memref<1x128x128xf32, #tpu.memory_space<vmem>>, vector<1x128x128xf32>
    %27 = vector.shape_cast %26 : vector<1x128x128xf32> to vector<128x128xf32>
    %28 = vector.shape_cast %25 : vector<128x128xf32> to vector<1x128x128xf32>
    tpu.vector_store %arg5[%c0_10, %c0_11, %c0_12], %28 {strides = array<i32>} : memref<1x128x128xf32, #tpu.memory_space<vmem>>, vector<1x128x128xf32>,
    return
  }
  func.func @transform_0(%arg0: i32, %arg1: i32) -> (i32, i32, i32) {
    %c0_i32 = arith.constant 0 : i32
    %c0_i32_0 = arith.constant 0 : i32
    %c0_i32_1 = arith.constant 0 : i32
    return %arg0, %c0_i32, %c0_i32_0 : i32, i32, i32
  }
  func.func @transform_1(%arg0: i32, %arg1: i32) -> (i32, i32, i32) {
    %c0_i32 = arith.constant 0 : i32
    %c0_i32_0 = arith.constant 0 : i32
    %c0_i32_1 = arith.constant 0 : i32
    return %arg0, %c0_i32, %c0_i32_0 : i32, i32, i32
  }
  func.func @transform_2(%arg0: i32, %arg1: i32) -> (i32, i32) {
    %c0_i32 = arith.constant 0 : i32
    %c0_i32_0 = arith.constant 0 : i32
    %c0_i32_1 = arith.constant 0 : i32
    return %c0_i32, %c0_i32_0 : i32, i32
  }
  func.func @transform_3(%arg0: i32, %arg1: i32) -> (i32, i32, i32) {
    %c0_i32 = arith.constant 0 : i32
    %c0_i32_0 = arith.constant 0 : i32
    return %arg0, %arg1, %c0_i32 : i32, i32, i32
  }
}

</mosaic_0001>

<bundles_post_ra>
// kernel: tpu_custom_call.1
= control target key start
LH: loop header
LB: loop body
LE: loop exit
PB: predicated region body
PF: predicated region fallthrough
CT: control target
= control target key end

     0   :  { %8 = vsyncpa [#allocation6], 0  ;;  %s4055_s0 = inlined_call_operand.vmem [shape: f32[2,256,128], index: 0, kind: input, shape index: {}]   ;;  %s4056_s1 = inlined_call_operand.vmem [shape: f32[2,256,1], index: 1, kind: input, shape index: {}]   ;;  %s4057_s2 = inlined_call_operand.hbm [shape: bf16[128,384], index: 2, kind: input, shape index: {}]   ;;  %s4058_s3 = inlined_call_operand.hbm [shape: f32[2,256,128], index: 3, kind: output, shape index: {}]  }
   0x1   :  { %9 = vsyncpa [#allocation7], 0 }
   0x2   :  { %11 = vsyncpa [#allocation7 + $0x1], 0  ;;  %s3590_s12 = smov 0   ;;  %s3592_s13 = smov 0  }
   0x3   :  { %s3594_s14 = smov 0   ;;  %s3596_s15 = smov 0  }
   0x4   :  { %s3598_s16 = smov 0   ;;  %s3600_s17 = smov 0  }
   0x5   :  { %s3602_s18 = smov 0   ;;  %s3604_s19 = smov 0  }
   0x6 LB: > { %s2434_s20 = sadd.s32 4294967295, %s3561_s19   ;;  %s2435_s21 = sadd.s32 4294967294, %s3561_s19   ;;  %s3561_s19 = sphi %s3604_s19, %s17_s19   ;;  %s3557_s18 = sphi %s3602_s18, %s4070_s18   ;;  %s3553_s17 = sphi %s3600_s17, %s4069_s17   ;;  %s3549_s16 = sphi %s3598_s16, %s4068_s16   ;;  %s3545_s15 = sphi %s3596_s15, %s4067_s15   ;;  %s3541_s14 = sphi %s3594_s14, %s4066_s14   ;;  %s3537_s13 = sphi %s3592_s13, %s4065_s13   ;;  %s3533_s12 = sphi %s3590_s12, %s4064_s12  }
   0x7   : > { %s26_s22 = sadd.s32 1, %s3553_s17  ;;  %s29_s23 = sadd.s32 1, %s3557_s18 }
   0x8   : > { %p27_p0 = scmp.ge.s32.totalorder %s26_s22, 2  ;;  %s111_s24 = sadd.s32 1, %s3541_s14 }
   0x9   : > { %p121_p1 = scmp.ne.s32.totalorder %s3541_s14, %s3537_s13  ;;  %p122_p2 = scmp.eq.s32.totalorder %s2434_s20, 3 }
   0xa   : > { %s4072_s22 = smov (%p27_p0, %s26_s22), 0  ;;  %s4074_s23 = smov (!%p27_p0, %s29_s23), %s3557_s18 }
   0xb   : > { %s107_s25 = ssub.s32 %s3553_s17, %s4072_s22  ;;  %p3642_p3 = por %p122_p2, %p121_p1 }
   0xc   : > { %p31_p4 = scmp.ge.s32.totalorder %s4074_s23, 2  ;;  %p127_p5 = scmp.ne.s32.totalorder %s3537_s13, %s3533_s12 }
   0xd   : > { %p128_p6 = scmp.eq.s32.totalorder %s2435_s21, 3  ;;  %p2436_p7 = scmp.ge.s32.totalorder %s3561_s19, 1 }
   0xe   : > { %s4076_s23 = smov (%p31_p4, %s4074_s23), 0  ;;  %p135_p9 = scmp.lt.s32.totalorder %s3561_s19, 5 }
   0xf   : > { %p3651_p8 = por %p128_p6, %p127_p5  ;;  %s106_s28 = ssub.s32 %s3557_s18, %s4076_s23 }
  0x10   : > { %s108_s29 = sor.u32 %s107_s25, %s106_s28  ;;  %p3658_p10 = pnand %p2436_p7, %p135_p9 }
  0x11   : > { %p109_p11 = scmp.eq.s32.totalorder %s108_s29, 0  ;;  %p3662_p12 = scmp.eq.s32.totalorder %s2434_s20, 0 }
  0x12   : > { %p3188_p13 = pneg %p3658_p10  ;;  %s3563_s6 = smov [#allocation5]  }
  0x13   : > { %s3669_s5 = scalar_select %p109_p11, %s3541_s14, %s111_s24  }
  0x14   : > { %s147_s7 = sshll.u32 %s3563_s6, 4  ;;  %p3673_p0 = pnand %p3662_p12, %p3188_p13  ;;  %s148_s7 = int_to_ptr.vmem [resolvable:$true] %s147_s7 }
  0x15   : > { %s3450_s9 = scalar_lea.vmem %s148_s7, 3072  ;;  %p3458_p6 = scmp.lt.s32.totalorder %s148_s7, %s148_s7 }
  0x16   : > { %p3441_p1 = pneg %p3673_p0  ;;  %p3451_p2 = scmp.ne.s32.totalorder %s148_s7, %s3450_s9 }
  0x17   : > { %p3459_p7 = scmp.lt.s32.totalorder %s3450_s9, %s3450_s9 }
  0x18   : > { %p3453_p4 = pnand %p3451_p2, %p3441_p1 }
  0x19   : > { %p3460_p9 = por %p3459_p7, %p3458_p6 }
  0x1a   : > { %p3454_p5 = pneg %p3453_p4 }
  0x1c   : > { %p3461_p11 = pnand %p3460_p9, %p3454_p5 }
  0x1e   : > { %3464 = shalt.err (!%p3461_p11)
}
  0x1f   : > { %s3564_s10 = smov 192   ;;  %s3565_s11 = smov 12  }
  0x20   : > { %3191 = dma.hbm_to_vmem [thread:$0]  (!%p3673_p0), %s4057_s2, 3072, %s148_s7, [#allocation6], %s3564_s10, %s3564_s10, %s3565_s11  }
  0x21   : > { %179 = sbr.rel (%p3658_p10) target bundleno = 1172 (0x494), region = 32 }
  0x26   : > { %3524 = dma.done.wait (%p3662_p12), [#allocation6], 3072  }
  0x27   : > { %3526 = vsyncadd (%p3662_p12), [#allocation6], 4294964224  ;;  %s205_s24 = sand.u32 1, %s3537_s13   ;;  %p208_p13 = scmp.lt.s32.totalorder %s3549_s16, 1 }
  0x28   : > { %s2441_s25 = sshll.u32 %s205_s24, 7  ;;  %p2446_p10 = scmp.ne.s32.totalorder %s3545_s15, 0 }
  0x29   : > { %s209_s28 = scalar_select %p208_p13, %s3549_s16, 1 }
  0x2a   : > { %s3705_s10 = scalar_lea.vmem [#allocation8], %s2441_s25  ;;  %223 = sbr.rel (%p2446_p10) target bundleno = 471 (0x1d7), region = 40 }
  0x2b   : > { %s2615_s29 = sshll.u32 %s209_s28, 8 }
  0x2c   : > { %s3698_s30 = scalar_lea.vmem %s4055_s0, %s2615_s29  ;;  %s3703_s4 = scalar_lea.vmem %s4056_s1, %s2615_s29 }
  0x2f   : > { %v280_v0 = vld [vmem:[%s3703_s4 + $0xc0] sm:$0xff]  ;;  %v3566_v2 = vmov 0   ;;  %v281_v3 = vld [vmem:[%s3703_s4 + $0xc8] sm:$0xff]  ;;  %v259_v5 = vld [vmem:[%s3703_s4 + $0x18] sm:$0xff] }
  0x30   : > { %v256_v1 = vld [vmem:[%s3703_s4] sm:$0xff]  ;;  %3270 = vset.pattern.permute.xlu1 %v3566_v2  ;;  %3269 = vset.pattern.permute.xlu0 %v3566_v2  ;;  %v257_v4 = vld [vmem:[%s3703_s4 + $0x8] sm:$0xff]  ;;  %v258_v6 = vld [vmem:[%s3703_s4 + $0x10] sm:$0xff] }
  0x31   : > { %410 = vperm.xlu1 %3270, %v280_v0   ;;  %290 = vperm.xlu0 %3269, %v256_v1   ;;  %v283_v7 = vld [vmem:[%s3703_s4 + $0xd8] sm:$0xff]  ;;  %v282_v8 = vld [vmem:[%s3703_s4 + $0xd0] sm:$0xff]  ;;  %v261_v12 = vld [vmem:[%s3703_s4 + $0x28] sm:$0xff] }
  0x32   : > { %688 = vmatprep.mubr.bf16.mxu0 %v3566_v2  ;;  %808 = vmatprep.mubr.bf16.mxu1 %v3566_v2  ;;  %v3271_v9 = vld [vmem:[#allocation5 + $0xac] ss:$12 sps:$4 sm:$0xff]   ;;  %v3273_v10 = vld [vmem:[#allocation5 + $0xa8] ss:$12 sps:$4 sm:$0xff]   ;;  %v260_v13 = vld [vmem:[%s3703_s4 + $0x20] sm:$0xff] }
  0x33   : > { %v3274_v11 = vld [vmem:[#allocation5 + $0x94] ss:$12 sps:$4 sm:$0xff]   ;;  %3166 = vmatprep.subr.bf16.mxu1 %v3271_v9  ;;  %656 = vmatprep.subr.bf16.mxu0 %v3271_v9  ;;  %v3276_v14 = vld [vmem:[#allocation5 + $0x90] ss:$12 sps:$4 sm:$0xff]   ;;  %v285_v16 = vld [vmem:[%s3703_s4 + $0xe8] sm:$0xff] }
  0x34   : > { %3174 = vmatpush1.bf16.msra.mxu1 %v3273_v10  ;;  %657 = vmatpush1.bf16.msra.mxu0 %v3273_v10  ;;  %v3277_v15 = vld [vmem:[#allocation5 + $0x7c] ss:$12 sps:$4 sm:$0xff]   ;;  %v284_v17 = vld [vmem:[%s3703_s4 + $0xe0] sm:$0xff]  ;;  %v262_v21 = vld [vmem:[%s3703_s4 + $0x30] sm:$0xff] }
  0x35   : > { %415 = vperm.xlu1 %3270, %v281_v3   ;;  %295 = vperm.xlu0 %3269, %v257_v4   ;;  %v3279_v18 = vld [vmem:[#allocation5 + $0x78] ss:$12 sps:$4 sm:$0xff]   ;;  %v3282_v22 = vld [vmem:[#allocation5 + $0x60] ss:$12 sps:$4 sm:$0xff]   ;;  %v286_v25 = vld [vmem:[%s3703_s4 + $0xf0] sm:$0xff] }
  0x36   : > { %3167 = vmatprep.subr.bf16.mxu1 %v3274_v11  ;;  %658 = vmatprep.subr.bf16.mxu0 %v3274_v11  ;;  %v3280_v19 = vld [vmem:[#allocation5 + $0x64] ss:$12 sps:$4 sm:$0xff]   ;;  %v263_v20 = vld [vmem:[%s3703_s4 + $0x38] sm:$0xff]  ;;  %v3285_v26 = vld [vmem:[#allocation5 + $0x48] ss:$12 sps:$4 sm:$0xff]  }
  0x37   : > { %v3283_v23 = vld [vmem:[#allocation5 + $0x4c] ss:$12 sps:$4 sm:$0xff]   ;;  %v3286_v27 = vld [vmem:[#allocation5 + $0x34] ss:$12 sps:$4 sm:$0xff]   ;;  %v3288_v30 = vld [vmem:[#allocation5 + $0x30] ss:$12 sps:$4 sm:$0xff]  }
  0x38   : > { %3175 = vmatpush1.bf16.msra.mxu1 %v3276_v14  ;;  %659 = vmatpush1.bf16.msra.mxu0 %v3276_v14  ;;  %v287_v24 = vld [vmem:[%s3703_s4 + $0xf8] sm:$0xff]  ;;  %v265_v28 = vld [vmem:[%s3703_s4 + $0x48] sm:$0xff]  ;;  %v264_v29 = vld [vmem:[%s3703_s4 + $0x40] sm:$0xff] }
  0x39   : > { %305 = vperm.xlu1 %3270, %v259_v5   ;;  %300 = vperm.xlu0 %3269, %v258_v6   ;;  %v3289_v31 = vld [vmem:[#allocation5 + $0x1c] ss:$12 sps:$4 sm:$0xff]   ;;  %v266_v33 = vld [vmem:[%s3703_s4 + $0x50] sm:$0xff]  ;;  %v3291_v34 = vld [vmem:[#allocation5 + $0x18] ss:$12 sps:$4 sm:$0xff]  }
  0x3a   : > { %3168 = vmatprep.subr.bf16.mxu1 %v3277_v15  ;;  %660 = vmatprep.subr.bf16.mxu0 %v3277_v15  ;;  %v267_v32 = vld [vmem:[%s3703_s4 + $0x58] sm:$0xff]  ;;  %v3292_v35 = vld [vmem:[#allocation5 + $0x4] ss:$12 sps:$4 sm:$0xff]   ;;  %v269_v36 = vld [vmem:[%s3703_s4 + $0x68] sm:$0xff] }
  0x3b   : > { %v268_v37 = vld [vmem:[%s3703_s4 + $0x60] sm:$0xff]  ;;  %v3295_v39 = vld [vmem:[#allocation5 + $0xb0] ss:$12 sps:$4 sm:$0xff]   ;;  %v273_v42 = vld [vmem:[%s3703_s4 + $0x88] sm:$0xff] }
  0x3c   : > { %3176 = vmatpush1.bf16.msra.mxu1 %v3279_v18  ;;  %661 = vmatpush1.bf16.msra.mxu0 %v3279_v18  ;;  %v3294_v38 = vld [vmem:[#allocation5] ss:$12 sps:$4 sm:$0xff]   ;;  %v271_v40 = vld [vmem:[%s3703_s4 + $0x78] sm:$0xff]  ;;  %v270_v41 = vld [vmem:[%s3703_s4 + $0x70] sm:$0xff] }
  0x3d   : > { %425 = vperm.xlu1 %3270, %v283_v7   ;;  %420 = vperm.xlu0 %3269, %v282_v8   ;;  %v272_v43 = vld [vmem:[%s3703_s4 + $0x80] sm:$0xff]  ;;  %v275_v44 = vld [vmem:[%s3703_s4 + $0x98] sm:$0xff]  ;;  %v274_v45 = vld [vmem:[%s3703_s4 + $0x90] sm:$0xff] }
  0x3e   : > { %3169 = vmatprep.subr.bf16.mxu1 %v3280_v19  ;;  %662 = vmatprep.subr.bf16.mxu0 %v3280_v19  ;;  %v277_v46 = vld [vmem:[%s3703_s4 + $0xa8] sm:$0xff]  ;;  %v276_v47 = vld [vmem:[%s3703_s4 + $0xa0] sm:$0xff]  ;;  %v279_v48 = vld [vmem:[%s3703_s4 + $0xb8] sm:$0xff] }
  0x3f   : > { %v278_v49 = vld [vmem:[%s3703_s4 + $0xb0] sm:$0xff]  ;;  %v248_v52 = vld [vmem:[%s3698_s30 + $0xc0] sm:$0xff]  ;;  %v249_v54 = vld [vmem:[%s3698_s30 + $0xc8] sm:$0xff] }
  0x40   : > { %3177 = vmatpush1.bf16.msra.mxu1 %v3282_v22  ;;  %663 = vmatpush1.bf16.msra.mxu0 %v3282_v22  ;;  %v224_v53 = vld [vmem:[%s3698_s30] sm:$0xff]  ;;  %v225_v55 = vld [vmem:[%s3698_s30 + $0x8] sm:$0xff]  ;;  %v227_v3 = vld [vmem:[%s3698_s30 + $0x18] sm:$0xff] }
  0x41   : > { %315 = vperm.xlu1 %3270, %v261_v12   ;;  %310 = vperm.xlu0 %3269, %v260_v13   ;;  %v3296_v0 = vld [vmem:[#allocation5 + $0x98] ss:$12 sps:$4 sm:$0xff]   ;;  %v226_v5 = vld [vmem:[%s3698_s30 + $0x10] sm:$0xff]  ;;  %v3297_v10 = vld [vmem:[#allocation5 + $0x80] ss:$12 sps:$4 sm:$0xff]  }
  0x42   : > { %3170 = vmatprep.subr.bf16.mxu1 %v3283_v23  ;;  %664 = vmatprep.subr.bf16.mxu0 %v3283_v23  ;;  %v251_v6 = vld [vmem:[%s3698_s30 + $0xd8] sm:$0xff]  ;;  %v250_v7 = vld [vmem:[%s3698_s30 + $0xd0] sm:$0xff]  ;;  %v229_v19 = vld [vmem:[%s3698_s30 + $0x28] sm:$0xff] }
  0x43   : > { %v253_v22 = vld [vmem:[%s3698_s30 + $0xe8] sm:$0xff]  ;;  %v252_v23 = vld [vmem:[%s3698_s30 + $0xe0] sm:$0xff] }
  0x44   : > { %3178 = vmatpush1.bf16.msra.mxu1 %v3285_v26  ;;  %665 = vmatpush1.bf16.msra.mxu0 %v3285_v26  ;;  %v3299_v26 = vld [vmem:[#allocation5 + $0x50] ss:$12 sps:$4 sm:$0xff]  }
  0x45   : > { %435 = vperm.xlu1 %3270, %v285_v16   ;;  %430 = vperm.xlu0 %3269, %v284_v17   ;;  %v3298_v17 = vld [vmem:[#allocation5 + $0x68] ss:$12 sps:$4 sm:$0xff]  }
  0x46   : > { %3171 = vmatprep.subr.bf16.mxu1 %v3286_v27  ;;  %666 = vmatprep.subr.bf16.mxu0 %v3286_v27 }
  0x48   : > { %3179 = vmatpush1.bf16.msra.mxu1 %v3288_v30  ;;  %667 = vmatpush1.bf16.msra.mxu0 %v3288_v30 }
  0x49   : > { %325 = vperm.xlu1 %3270, %v263_v20   ;;  %320 = vperm.xlu0 %3269, %v262_v21   ;;  %v228_v21 = vld [vmem:[%s3698_s30 + $0x20] sm:$0xff] }
  0x4a   : > { %3172 = vmatprep.subr.bf16.mxu1 %v3289_v31  ;;  %668 = vmatprep.subr.bf16.mxu0 %v3289_v31 }
  0x4c   : > { %3180 = vmatpush1.bf16.msra.mxu1 %v3291_v34  ;;  %669 = vmatpush1.bf16.msra.mxu0 %v3291_v34 }
  0x4d   : > { %445 = vperm.xlu1 %3270, %v287_v24   ;;  %440 = vperm.xlu0 %3269, %v286_v25  }
  0x4e   : > { %3173 = vmatprep.subr.bf16.mxu1 %v3292_v35  ;;  %670 = vmatprep.subr.bf16.mxu0 %v3292_v35  ;;  %v231_v35 = vld [vmem:[%s3698_s30 + $0x38] sm:$0xff] }
  0x50   : > { %3181 = vmatpush1.bf16.msra.mxu1 %v3294_v38  ;;  %671 = vmatpush1.bf16.msra.mxu0 %v3294_v38  ;;  %v255_v38 = vld [vmem:[%s3698_s30 + $0xf8] sm:$0xff] }
  0x51   : > { %335 = vperm.xlu1 %3270, %v265_v28   ;;  %330 = vperm.xlu0 %3269, %v264_v29  }
  0x52   : > { %3118 = vmatprep.subr.bf16.mxu1 %v3295_v39 }
  0x55   : > { %345 = vperm.xlu1 %3270, %v267_v32   ;;  %340 = vperm.xlu0 %3269, %v266_v33   ;;  %v3300_v33 = vld [vmem:[#allocation5 + $0x38] ss:$12 sps:$4 sm:$0xff]  }
  0x59   : > { %355 = vperm.xlu1 %3270, %v269_v36   ;;  %350 = vperm.xlu0 %3269, %v268_v37   ;;  %v230_v37 = vld [vmem:[%s3698_s30 + $0x30] sm:$0xff] }
  0x5d   : > { %365 = vperm.xlu1 %3270, %v271_v40   ;;  %360 = vperm.xlu0 %3269, %v270_v41  }
  0x61   : > { %375 = vperm.xlu1 %3270, %v273_v42   ;;  %370 = vperm.xlu0 %3269, %v272_v43   ;;  %v3301_v42 = vld [vmem:[#allocation5 + $0x20] ss:$12 sps:$4 sm:$0xff]  }
  0x65   : > { %385 = vperm.xlu1 %3270, %v275_v44   ;;  %380 = vperm.xlu0 %3269, %v274_v45  }
  0x69   : > { %395 = vperm.xlu1 %3270, %v277_v46   ;;  %390 = vperm.xlu0 %3269, %v276_v47  }
  0x6d   : > { %405 = vperm.xlu1 %3270, %v279_v48   ;;  %400 = vperm.xlu0 %3269, %v278_v49   ;;  %v3302_v49 = vld [vmem:[#allocation5 + $0x8] ss:$12 sps:$4 sm:$0xff]  }
  0xac   : > { %v411_v50 = vpop.permute.xlu1 %410  ;;  %v291_v51 = vpop.permute.xlu0 %290 }
  0xad   : > { %v472_v58 = vmul.f32 %v411_v50, %v248_v52  ;;  %v448_v59 = vmul.f32 %v291_v51, %v224_v53  ;;  %v233_v51 = vld [vmem:[%s3698_s30 + $0x48] sm:$0xff]  ;;  %v232_v53 = vld [vmem:[%s3698_s30 + $0x40] sm:$0xff] }
  0xb0   : > { %v416_v56 = vpop.permute.xlu1 %415  ;;  %v296_v57 = vpop.permute.xlu0 %295 }
  0xb1   : > { %v473_v60 = vmul.f32 %v416_v56, %v249_v54  ;;  %v449_v61 = vmul.f32 %v296_v57, %v225_v55 }
  0xb3   : > { %v3748_v62 = vpack.c.bf16 %v473_v60, %v472_v58  ;;  %v3750_v63 = vpack.c.bf16 %v449_v61, %v448_v59  ;;  %v235_v59 = vld [vmem:[%s3698_s30 + $0x58] sm:$0xff]  ;;  %v234_v60 = vld [vmem:[%s3698_s30 + $0x50] sm:$0xff] }
  0xb4   : > { %v306_v1 = vpop.permute.xlu1 %305  ;;  %v301_v4 = vpop.permute.xlu0 %300 }
  0xb5   : > { %689 = vmatmul.mubr.bf16.vlgmr.msra.gmra.mxu0 %v3750_v63  ;;  %809 = vmatmul.mubr.bf16.vlgmr.msra.gmra.mxu1 %v3748_v62  ;;  %v451_v8 = vmul.f32 %v306_v1, %v227_v3  ;;  %v450_v9 = vmul.f32 %v301_v4, %v226_v5 }
  0xb6   : > { %3119 = vmatpush3.bf16.msra.mxu1 %v3295_v39  ;;  %698 = vmatprep.mubr.bf16.mxu0 %v3566_v2  ;;  %v254_v39 = vld [vmem:[%s3698_s30 + $0xf0] sm:$0xff] }
  0xb7   : > { %3120 = vmatprep.subr.bf16.mxu1 %v3296_v0  ;;  %818 = vmatprep.mubr.bf16.mxu1 %v3566_v2  ;;  %v3760_v15 = vpack.c.bf16 %v451_v8, %v450_v9 }
  0xb8   : > { %v426_v11 = vpop.permute.xlu1 %425  ;;  %v421_v12 = vpop.permute.xlu0 %420 }
  0xb9   : > { %v475_v13 = vmul.f32 %v426_v11, %v251_v6  ;;  %v474_v14 = vmul.f32 %v421_v12, %v250_v7  ;;  %v237_v6 = vld [vmem:[%s3698_s30 + $0x68] sm:$0xff]  ;;  %v236_v7 = vld [vmem:[%s3698_s30 + $0x60] sm:$0xff] }
  0xba   : > { %3121 = vmatpush3.bf16.msra.mxu1 %v3296_v0 }
  0xbb   : > { %v3762_v16 = vpack.c.bf16 %v475_v13, %v474_v14  ;;  %3122 = vmatprep.subr.bf16.mxu1 %v3297_v10  ;;  %v239_v13 = vld [vmem:[%s3698_s30 + $0x78] sm:$0xff]  ;;  %v238_v14 = vld [vmem:[%s3698_s30 + $0x70] sm:$0xff] }
  0xbc   : > { %v316_v18 = vpop.permute.xlu1 %315  ;;  %v311_v20 = vpop.permute.xlu0 %310 }
  0xbd   : > { %699 = vmatmul.mubr.bf16.gmra.mxu0 %v3760_v15  ;;  %819 = vmatmul.mubr.bf16.gmra.mxu1 %v3762_v16  ;;  %v453_v24 = vmul.f32 %v316_v18, %v229_v19  ;;  %v452_v25 = vmul.f32 %v311_v20, %v228_v21 }
  0xbe   : > { %3123 = vmatpush3.bf16.msra.mxu1 %v3297_v10  ;;  %708 = vmatprep.mubr.bf16.mxu0 %v3566_v2 }
  0xbf   : > { %3124 = vmatprep.subr.bf16.mxu1 %v3298_v17  ;;  %828 = vmatprep.mubr.bf16.mxu1 %v3566_v2  ;;  %v482_v31 = vpack.c.bf16 %v453_v24, %v452_v25 }
  0xc0   : > { %v436_v27 = vpop.permute.xlu1 %435  ;;  %v431_v28 = vpop.permute.xlu0 %430 }
  0xc1   : > { %v477_v29 = vmul.f32 %v436_v27, %v253_v22  ;;  %v476_v30 = vmul.f32 %v431_v28, %v252_v23  ;;  %v242_v27 = vld [vmem:[%s3698_s30 + $0x90] sm:$0xff] }
  0xc2   : > { %3125 = vmatpush3.bf16.msra.mxu1 %v3298_v17  ;;  %v240_v17 = vld [vmem:[%s3698_s30 + $0x80] sm:$0xff] }
  0xc3   : > { %v3772_v32 = vpack.c.bf16 %v477_v29, %v476_v30  ;;  %3126 = vmatprep.subr.bf16.mxu1 %v3299_v26  ;;  %v245_v29 = vld [vmem:[%s3698_s30 + $0xa8] sm:$0xff] }
  0xc4   : > { %v326_v34 = vpop.permute.xlu1 %325  ;;  %v321_v36 = vpop.permute.xlu0 %320 }
  0xc5   : > { %709 = vmatmul.mubr.bf16.gmra.mxu0 %v482_v31  ;;  %829 = vmatmul.mubr.bf16.gmra.mxu1 %v3772_v32  ;;  %v455_v40 = vmul.f32 %v326_v34, %v231_v35  ;;  %v454_v41 = vmul.f32 %v321_v36, %v230_v37 }
  0xc6   : > { %3127 = vmatpush3.bf16.msra.mxu1 %v3299_v26  ;;  %718 = vmatprep.mubr.bf16.mxu0 %v3566_v2  ;;  %v243_v26 = vld [vmem:[%s3698_s30 + $0x98] sm:$0xff] }
  0xc7   : > { %3128 = vmatprep.subr.bf16.mxu1 %v3300_v33  ;;  %838 = vmatprep.mubr.bf16.mxu1 %v3566_v2  ;;  %v483_v47 = vpack.c.bf16 %v455_v40, %v454_v41  ;;  %v247_v40 = vld [vmem:[%s3698_s30 + $0xb8] sm:$0xff] }
  0xc8   : > { %v446_v43 = vpop.permute.xlu1 %445  ;;  %v441_v44 = vpop.permute.xlu0 %440 }
  0xc9   : > { %v479_v45 = vmul.f32 %v446_v43, %v255_v38  ;;  %v478_v46 = vmul.f32 %v441_v44, %v254_v39 }
  0xca   : > { %3129 = vmatpush3.bf16.msra.mxu1 %v3300_v33 }
  0xcb   : > { %v3781_v48 = vpack.c.bf16 %v479_v45, %v478_v46  ;;  %3130 = vmatprep.subr.bf16.mxu1 %v3301_v42 }
  0xcc   : > { %v336_v50 = vpop.permute.xlu1 %335  ;;  %v331_v52 = vpop.permute.xlu0 %330 }
  0xcd   : > { %719 = vmatmul.mubr.bf16.gmra.mxu0 %v483_v47  ;;  %839 = vmatmul.mubr.bf16.gmra.mxu1 %v3781_v48  ;;  %v457_v54 = vmul.f32 %v336_v50, %v233_v51  ;;  %v456_v55 = vmul.f32 %v331_v52, %v232_v53 }
  0xce   : > { %3131 = vmatpush3.bf16.msra.mxu1 %v3301_v42  ;;  %3134 = vmatprep.mubr.bf16.mxu1 %v3750_v63  ;;  %v246_v42 = vld [vmem:[%s3698_s30 + $0xb0] sm:$0xff] }
  0xcf   : > { %3132 = vmatprep.subr.bf16.mxu1 %v3302_v49  ;;  %728 = vmatprep.mubr.bf16.mxu0 %v3566_v2  ;;  %v484_v58 = vpack.c.bf16 %v457_v54, %v456_v55 }
  0xd0   : > { %v346_v56 = vpop.permute.xlu1 %345  ;;  %v341_v57 = vpop.permute.xlu0 %340 }
  0xd1   : > { %v459_v63 = vmul.f32 %v346_v56, %v235_v59  ;;  %v458_v1 = vmul.f32 %v341_v57, %v234_v60 }
  0xd2   : > { %3133 = vmatpush3.bf16.msra.mxu1 %v3302_v49 }
  0xd3   : > { %v485_v3 = vpack.c.bf16 %v459_v63, %v458_v1 }
  0xd4   : > { %v356_v61 = vpop.permute.xlu1 %355  ;;  %v351_v0 = vpop.permute.xlu0 %350 }
  0xd5   : > { %729 = vmatmul.mubr.bf16.gmra.mxu0 %v484_v58  ;;  %3135 = vmatmul.mubr.bf16.vlgmr.msra.gmra.mxu1 %v3760_v15  ;;  %v461_v8 = vmul.f32 %v356_v61, %v237_v6  ;;  %v460_v9 = vmul.f32 %v351_v0, %v236_v7  ;;  %v241_v15 = vld [vmem:[%s3698_s30 + $0x88] sm:$0xff] }
  0xd6   : > { %3138 = vmatprep.mubr.bf16.mxu1 %v482_v31  ;;  %738 = vmatprep.mubr.bf16.mxu0 %v3566_v2  ;;  %v244_v31 = vld [vmem:[%s3698_s30 + $0xa0] sm:$0xff] }
  0xd7   : > { %v486_v12 = vpack.c.bf16 %v461_v8, %v460_v9 }
  0xd8   : > { %v366_v4 = vpop.permute.xlu1 %365  ;;  %v361_v5 = vpop.permute.xlu0 %360 }
  0xd9   : > { %v463_v18 = vmul.f32 %v366_v4, %v239_v13  ;;  %v462_v19 = vmul.f32 %v361_v5, %v238_v14 }
  0xdb   : > { %v487_v24 = vpack.c.bf16 %v463_v18, %v462_v19 }
  0xdc   : > { %v376_v10 = vpop.permute.xlu1 %375  ;;  %v371_v11 = vpop.permute.xlu0 %370 }
  0xdd   : > { %739 = vmatmul.mubr.bf16.gmra.mxu0 %v485_v3  ;;  %3139 = vmatmul.mubr.bf16.gmra.mxu1 %v483_v47  ;;  %v465_v22 = vmul.f32 %v376_v10, %v241_v15  ;;  %v464_v23 = vmul.f32 %v371_v11, %v240_v17 }
  0xde   : > { %3142 = vmatprep.mubr.bf16.mxu1 %v484_v58  ;;  %748 = vmatprep.mubr.bf16.mxu0 %v3566_v2 }
  0xdf   : > { %v488_v25 = vpack.c.bf16 %v465_v22, %v464_v23 }
  0xe0   : > { %v386_v20 = vpop.permute.xlu1 %385  ;;  %v381_v21 = vpop.permute.xlu0 %380 }
  0xe1   : > { %v467_v33 = vmul.f32 %v386_v20, %v243_v26  ;;  %v466_v34 = vmul.f32 %v381_v21, %v242_v27 }
  0xe3   : > { %v489_v37 = vpack.c.bf16 %v467_v33, %v466_v34 }
  0xe4   : > { %v396_v28 = vpop.permute.xlu1 %395  ;;  %v391_v30 = vpop.permute.xlu0 %390 }
  0xe5   : > { %749 = vmatmul.mubr.bf16.gmra.mxu0 %v486_v12  ;;  %3143 = vmatmul.mubr.bf16.gmra.mxu1 %v485_v3  ;;  %v469_v35 = vmul.f32 %v396_v28, %v245_v29  ;;  %v468_v36 = vmul.f32 %v391_v30, %v244_v31 }
  0xe6   : > { %3146 = vmatprep.mubr.bf16.mxu1 %v486_v12  ;;  %758 = vmatprep.mubr.bf16.mxu0 %v3566_v2 }
  0xe7   : > { %v490_v38 = vpack.c.bf16 %v469_v35, %v468_v36 }
  0xe8   : > { %v406_v39 = vpop.permute.xlu1 %405  ;;  %v401_v41 = vpop.permute.xlu0 %400 }
  0xe9   : > { %v471_v43 = vmul.f32 %v406_v39, %v247_v40  ;;  %v470_v44 = vmul.f32 %v401_v41, %v246_v42 }
  0xeb   : > { %v491_v45 = vpack.c.bf16 %v471_v43, %v470_v44 }
  0xed   : > { %759 = vmatmul.mubr.bf16.gmra.mxu0 %v487_v24  ;;  %3147 = vmatmul.mubr.bf16.gmra.mxu1 %v487_v24 }
  0xee   : > { %3150 = vmatprep.mubr.bf16.mxu1 %v488_v25  ;;  %768 = vmatprep.mubr.bf16.mxu0 %v3566_v2 }
  0xf5   : > { %769 = vmatmul.mubr.bf16.gmra.mxu0 %v488_v25  ;;  %3151 = vmatmul.mubr.bf16.gmra.mxu1 %v489_v37 }
  0xf6   : > { %3154 = vmatprep.mubr.bf16.mxu1 %v490_v38  ;;  %778 = vmatprep.mubr.bf16.mxu0 %v3566_v2 }
  0xfd   : > { %779 = vmatmul.mubr.bf16.gmra.mxu0 %v489_v37  ;;  %3155 = vmatmul.mubr.bf16.gmra.mxu1 %v491_v45 }
  0xfe   : > { %3158 = vmatprep.mubr.bf16.mxu1 %v3748_v62  ;;  %788 = vmatprep.mubr.bf16.mxu0 %v3566_v2 }
 0x105   : > { %789 = vmatmul.mubr.bf16.gmra.mxu0 %v490_v38  ;;  %3159 = vmatmul.mubr.bf16.gmra.mxu1 %v3762_v16 }
 0x106   : > { %3162 = vmatprep.mubr.bf16.mxu1 %v3772_v32  ;;  %798 = vmatprep.mubr.bf16.mxu0 %v3566_v2 }
 0x10d   : > { %799 = vmatmul.mubr.bf16.gmra.mxu0 %v491_v45  ;;  %3163 = vmatmul.mubr.bf16.gmra.mxu1 %v3781_v48 }
 0x175   : > { %v690_v46 = vpop.f32.mrf.mxu0  ;;  %v810_v47 = vpop.f32.mrf.mxu1 }
 0x177   : > { %v692_v49 = vpop.f32.mrf.mxu0  ;;  %v812_v50 = vpop.f32.mrf.mxu1 }
 0x179   : > { %v694_v51 = vpop.f32.mrf.mxu0  ;;  %v814_v52 = vpop.f32.mrf.mxu1 }
 0x17a   : > { %v2716_v53 = vpack.c.bf16 %v694_v51, %v690_v46  ;;  %v2776_v62 = vpack.c.bf16 %v814_v52, %v810_v47 }
 0x17b   : > { %v696_v54 = vpop.f32.mrf.mxu0  ;;  %v816_v55 = vpop.f32.mrf.mxu1 }
 0x17c   : > { %2717 = vst [vmem:[#allocation2] sm:$0xff] %v2716_v53   ;;  %2964 = vst [vmem:[#allocation2 + $0x60] sm:$0xff] %v2776_v62   ;;  %v2796_v16 = vpack.c.bf16 %v696_v54, %v692_v49  ;;  %v2856_v56 = vpack.c.bf16 %v816_v55, %v812_v50 }
 0x17d   : > { %v700_v32 = vpop.f32.mrf.mxu0  ;;  %v820_v57 = vpop.f32.mrf.mxu1 }
 0x17e   : > { %2797 = vst [vmem:[#allocation3] sm:$0xff] %v2796_v16   ;;  %2979 = vst [vmem:[#allocation3 + $0x60] sm:$0xff] %v2856_v56  }
 0x17f   : > { %v702_v2 = vpop.f32.mrf.mxu0  ;;  %v822_v48 = vpop.f32.mrf.mxu1 }
 0x181   : > { %v704_v58 = vpop.f32.mrf.mxu0  ;;  %v824_v59 = vpop.f32.mrf.mxu1 }
 0x182   : > { %v2721_v60 = vpack.c.bf16 %v704_v58, %v700_v32  ;;  %v2781_v61 = vpack.c.bf16 %v824_v59, %v820_v57 }
 0x183   : > { %v706_v0 = vpop.f32.mrf.mxu0  ;;  %v826_v63 = vpop.f32.mrf.mxu1 }
 0x184   : > { %2953 = vst [vmem:[#allocation2 + $0x8] sm:$0xff] %v2721_v60   ;;  %2965 = vst [vmem:[#allocation2 + $0x68] sm:$0xff] %v2781_v61   ;;  %v2801_v1 = vpack.c.bf16 %v706_v0, %v702_v2  ;;  %v2861_v3 = vpack.c.bf16 %v826_v63, %v822_v48 }
 0x185   : > { %v710_v4 = vpop.f32.mrf.mxu0  ;;  %v830_v5 = vpop.f32.mrf.mxu1 }
 0x186   : > { %2968 = vst [vmem:[#allocation3 + $0x8] sm:$0xff] %v2801_v1   ;;  %2980 = vst [vmem:[#allocation3 + $0x68] sm:$0xff] %v2861_v3  }
 0x187   : > { %v712_v6 = vpop.f32.mrf.mxu0  ;;  %v832_v7 = vpop.f32.mrf.mxu1 }
 0x189   : > { %v714_v8 = vpop.f32.mrf.mxu0  ;;  %v834_v9 = vpop.f32.mrf.mxu1 }
 0x18a   : > { %v2726_v10 = vpack.c.bf16 %v714_v8, %v710_v4  ;;  %v2786_v11 = vpack.c.bf16 %v834_v9, %v830_v5 }
 0x18b   : > { %v716_v12 = vpop.f32.mrf.mxu0  ;;  %v836_v13 = vpop.f32.mrf.mxu1 }
 0x18c   : > { %2954 = vst [vmem:[#allocation2 + $0x10] sm:$0xff] %v2726_v10   ;;  %2966 = vst [vmem:[#allocation2 + $0x70] sm:$0xff] %v2786_v11   ;;  %v2806_v14 = vpack.c.bf16 %v716_v12, %v712_v6  ;;  %v2866_v15 = vpack.c.bf16 %v836_v13, %v832_v7 }
 0x18d   : > { %v720_v17 = vpop.f32.mrf.mxu0  ;;  %v840_v18 = vpop.f32.mrf.mxu1 }
 0x18e   : > { %2969 = vst [vmem:[#allocation3 + $0x10] sm:$0xff] %v2806_v14   ;;  %2981 = vst [vmem:[#allocation3 + $0x70] sm:$0xff] %v2866_v15  }
 0x18f   : > { %v722_v19 = vpop.f32.mrf.mxu0  ;;  %v842_v20 = vpop.f32.mrf.mxu1 }
 0x191   : > { %v724_v21 = vpop.f32.mrf.mxu0  ;;  %v844_v22 = vpop.f32.mrf.mxu1 }
 0x192   : > { %v2731_v23 = vpack.c.bf16 %v724_v21, %v720_v17  ;;  %v2791_v24 = vpack.c.bf16 %v844_v22, %v840_v18 }
 0x193   : > { %v726_v25 = vpop.f32.mrf.mxu0  ;;  %v846_v26 = vpop.f32.mrf.mxu1 }
 0x194   : > { %2955 = vst [vmem:[#allocation2 + $0x18] sm:$0xff] %v2731_v23   ;;  %2967 = vst [vmem:[#allocation2 + $0x78] sm:$0xff] %v2791_v24   ;;  %v2811_v27 = vpack.c.bf16 %v726_v25, %v722_v19  ;;  %v2871_v28 = vpack.c.bf16 %v846_v26, %v842_v20 }
 0x195   : > { %v730_v29 = vpop.f32.mrf.mxu0  ;;  %v3136_v30 = vpop.f32.mrf.mxu1 }
 0x196   : > { %2970 = vst [vmem:[#allocation3 + $0x18] sm:$0xff] %v2811_v27   ;;  %2982 = vst [vmem:[#allocation3 + $0x78] sm:$0xff] %v2871_v28  }
 0x197   : > { %v732_v31 = vpop.f32.mrf.mxu0  ;;  %v883_v33 = vpop.f32.mrf.mxu1 }
 0x199   : > { %v734_v34 = vpop.f32.mrf.mxu0  ;;  %v3137_v35 = vpop.f32.mrf.mxu1 }
 0x19a   : > { %v2736_v36 = vpack.c.bf16 %v734_v34, %v730_v29  ;;  %v2881_v37 = vpack.c.bf16 %v3137_v35, %v3136_v30 }
 0x19b   : > { %v736_v38 = vpop.f32.mrf.mxu0  ;;  %v886_v39 = vpop.f32.mrf.mxu1 }
 0x19c   : > { %2956 = vst [vmem:[#allocation2 + $0x20] sm:$0xff] %v2736_v36   ;;  %2983 = vst [vmem:[#allocation4 + $0x8] sm:$0xff] %v2881_v37   ;;  %v2816_v40 = vpack.c.bf16 %v736_v38, %v732_v31  ;;  %v2876_v41 = vpack.c.bf16 %v886_v39, %v883_v33 }
 0x19d   : > { %v740_v42 = vpop.f32.mrf.mxu0  ;;  %v3140_v43 = vpop.f32.mrf.mxu1 }
 0x19e   : > { %2971 = vst [vmem:[#allocation3 + $0x20] sm:$0xff] %v2816_v40   ;;  %2877 = vst [vmem:[#allocation4] sm:$0xff] %v2876_v41  }
 0x19f   : > { %v742_v44 = vpop.f32.mrf.mxu0  ;;  %v899_v45 = vpop.f32.mrf.mxu1 }
 0x1a1   : > { %v744_v46 = vpop.f32.mrf.mxu0  ;;  %v3141_v47 = vpop.f32.mrf.mxu1 }
 0x1a2   : > { %v2741_v49 = vpack.c.bf16 %v744_v46, %v740_v42  ;;  %v2891_v50 = vpack.c.bf16 %v3141_v47, %v3140_v43 }
 0x1a3   : > { %v746_v51 = vpop.f32.mrf.mxu0  ;;  %v902_v52 = vpop.f32.mrf.mxu1 }
 0x1a4   : > { %2957 = vst [vmem:[#allocation2 + $0x28] sm:$0xff] %v2741_v49   ;;  %2985 = vst [vmem:[#allocation4 + $0x18] sm:$0xff] %v2891_v50   ;;  %v2821_v53 = vpack.c.bf16 %v746_v51, %v742_v44  ;;  %v2886_v62 = vpack.c.bf16 %v902_v52, %v899_v45 }
 0x1a5   : > { %v750_v54 = vpop.f32.mrf.mxu0  ;;  %v3144_v55 = vpop.f32.mrf.mxu1 }
 0x1a6   : > { %2972 = vst [vmem:[#allocation3 + $0x28] sm:$0xff] %v2821_v53   ;;  %2984 = vst [vmem:[#allocation4 + $0x10] sm:$0xff] %v2886_v62  }
 0x1a7   : > { %v752_v16 = vpop.f32.mrf.mxu0  ;;  %v915_v56 = vpop.f32.mrf.mxu1 }
 0x1a9   : > { %v754_v32 = vpop.f32.mrf.mxu0  ;;  %v3145_v57 = vpop.f32.mrf.mxu1 }
 0x1aa   : > { %v2746_v2 = vpack.c.bf16 %v754_v32, %v750_v54  ;;  %v2901_v48 = vpack.c.bf16 %v3145_v57, %v3144_v55 }
 0x1ab   : > { %v756_v58 = vpop.f32.mrf.mxu0  ;;  %v918_v59 = vpop.f32.mrf.mxu1 }
 0x1ac   : > { %2958 = vst [vmem:[#allocation2 + $0x30] sm:$0xff] %v2746_v2   ;;  %2987 = vst [vmem:[#allocation4 + $0x28] sm:$0xff] %v2901_v48   ;;  %v2826_v60 = vpack.c.bf16 %v756_v58, %v752_v16  ;;  %v2896_v61 = vpack.c.bf16 %v918_v59, %v915_v56 }
 0x1ad   : > { %v760_v0 = vpop.f32.mrf.mxu0  ;;  %v3148_v63 = vpop.f32.mrf.mxu1 }
 0x1ae   : > { %2973 = vst [vmem:[#allocation3 + $0x30] sm:$0xff] %v2826_v60   ;;  %2986 = vst [vmem:[#allocation4 + $0x20] sm:$0xff] %v2896_v61  }
 0x1af   : > { %v762_v1 = vpop.f32.mrf.mxu0  ;;  %v931_v3 = vpop.f32.mrf.mxu1 }
 0x1b1   : > { %v764_v4 = vpop.f32.mrf.mxu0  ;;  %v3149_v5 = vpop.f32.mrf.mxu1 }
 0x1b2   : > { %v2751_v6 = vpack.c.bf16 %v764_v4, %v760_v0  ;;  %v2911_v7 = vpack.c.bf16 %v3149_v5, %v3148_v63 }
 0x1b3   : > { %v766_v8 = vpop.f32.mrf.mxu0  ;;  %v934_v9 = vpop.f32.mrf.mxu1 }
 0x1b4   : > { %2959 = vst [vmem:[#allocation2 + $0x38] sm:$0xff] %v2751_v6   ;;  %2989 = vst [vmem:[#allocation4 + $0x38] sm:$0xff] %v2911_v7   ;;  %v2831_v10 = vpack.c.bf16 %v766_v8, %v762_v1  ;;  %v2906_v11 = vpack.c.bf16 %v934_v9, %v931_v3 }
 0x1b5   : > { %v770_v12 = vpop.f32.mrf.mxu0  ;;  %v3152_v13 = vpop.f32.mrf.mxu1 }
 0x1b6   : > { %2974 = vst [vmem:[#allocation3 + $0x38] sm:$0xff] %v2831_v10   ;;  %2988 = vst [vmem:[#allocation4 + $0x30] sm:$0xff] %v2906_v11  }
 0x1b7   : > { %v772_v14 = vpop.f32.mrf.mxu0  ;;  %v947_v15 = vpop.f32.mrf.mxu1 }
 0x1b9   : > { %v774_v17 = vpop.f32.mrf.mxu0  ;;  %v3153_v18 = vpop.f32.mrf.mxu1 }
 0x1ba   : > { %v2756_v19 = vpack.c.bf16 %v774_v17, %v770_v12  ;;  %v2921_v20 = vpack.c.bf16 %v3153_v18, %v3152_v13 }
 0x1bb   : > { %v776_v21 = vpop.f32.mrf.mxu0  ;;  %v950_v22 = vpop.f32.mrf.mxu1 }
 0x1bc   : > { %2960 = vst [vmem:[#allocation2 + $0x40] sm:$0xff] %v2756_v19   ;;  %2991 = vst [vmem:[#allocation4 + $0x48] sm:$0xff] %v2921_v20   ;;  %v2836_v23 = vpack.c.bf16 %v776_v21, %v772_v14  ;;  %v2916_v24 = vpack.c.bf16 %v950_v22, %v947_v15 }
 0x1bd   : > { %v780_v25 = vpop.f32.mrf.mxu0  ;;  %v3156_v26 = vpop.f32.mrf.mxu1 }
 0x1be   : > { %2975 = vst [vmem:[#allocation3 + $0x40] sm:$0xff] %v2836_v23   ;;  %2990 = vst [vmem:[#allocation4 + $0x40] sm:$0xff] %v2916_v24  }
 0x1bf   : > { %v782_v27 = vpop.f32.mrf.mxu0  ;;  %v963_v28 = vpop.f32.mrf.mxu1 }
 0x1c1   : > { %v784_v29 = vpop.f32.mrf.mxu0  ;;  %v3157_v30 = vpop.f32.mrf.mxu1 }
 0x1c2   : > { %v2761_v31 = vpack.c.bf16 %v784_v29, %v780_v25  ;;  %v2931_v33 = vpack.c.bf16 %v3157_v30, %v3156_v26 }
 0x1c3   : > { %v786_v34 = vpop.f32.mrf.mxu0  ;;  %v966_v35 = vpop.f32.mrf.mxu1 }
 0x1c4   : > { %2961 = vst [vmem:[#allocation2 + $0x48] sm:$0xff] %v2761_v31   ;;  %2993 = vst [vmem:[#allocation4 + $0x58] sm:$0xff] %v2931_v33   ;;  %v2841_v36 = vpack.c.bf16 %v786_v34, %v782_v27  ;;  %v2926_v37 = vpack.c.bf16 %v966_v35, %v963_v28 }
 0x1c5   : > { %v790_v38 = vpop.f32.mrf.mxu0  ;;  %v3160_v39 = vpop.f32.mrf.mxu1 }
 0x1c6   : > { %2976 = vst [vmem:[#allocation3 + $0x48] sm:$0xff] %v2841_v36   ;;  %2992 = vst [vmem:[#allocation4 + $0x50] sm:$0xff] %v2926_v37  }
 0x1c7   : > { %v792_v40 = vpop.f32.mrf.mxu0  ;;  %v979_v41 = vpop.f32.mrf.mxu1 }
 0x1c9   : > { %v794_v42 = vpop.f32.mrf.mxu0  ;;  %v3161_v43 = vpop.f32.mrf.mxu1 }
 0x1ca   : > { %v2766_v44 = vpack.c.bf16 %v794_v42, %v790_v38  ;;  %v2941_v45 = vpack.c.bf16 %v3161_v43, %v3160_v39 }
 0x1cb   : > { %v796_v46 = vpop.f32.mrf.mxu0  ;;  %v982_v47 = vpop.f32.mrf.mxu1 }
 0x1cc   : > { %2962 = vst [vmem:[#allocation2 + $0x50] sm:$0xff] %v2766_v44   ;;  %2995 = vst [vmem:[#allocation4 + $0x68] sm:$0xff] %v2941_v45   ;;  %v2846_v49 = vpack.c.bf16 %v796_v46, %v792_v40  ;;  %v2936_v50 = vpack.c.bf16 %v982_v47, %v979_v41 }
 0x1cd   : > { %v800_v51 = vpop.f32.mrf.mxu0  ;;  %v3164_v52 = vpop.f32.mrf.mxu1 }
 0x1ce   : > { %2977 = vst [vmem:[#allocation3 + $0x50] sm:$0xff] %v2846_v49   ;;  %2994 = vst [vmem:[#allocation4 + $0x60] sm:$0xff] %v2936_v50  }
 0x1cf   : > { %v802_v53 = vpop.f32.mrf.mxu0  ;;  %v995_v62 = vpop.f32.mrf.mxu1 }
 0x1d1   : > { %v804_v54 = vpop.f32.mrf.mxu0  ;;  %v3165_v55 = vpop.f32.mrf.mxu1 }
 0x1d2   : > { %v2771_v16 = vpack.c.bf16 %v804_v54, %v800_v51  ;;  %v2951_v56 = vpack.c.bf16 %v3165_v55, %v3164_v52 }
 0x1d3   : > { %v806_v32 = vpop.f32.mrf.mxu0  ;;  %v998_v57 = vpop.f32.mrf.mxu1 }
 0x1d4   : > { %2963 = vst [vmem:[#allocation2 + $0x58] sm:$0xff] %v2771_v16   ;;  %2997 = vst [vmem:[#allocation4 + $0x78] sm:$0xff] %v2951_v56   ;;  %v2851_v2 = vpack.c.bf16 %v806_v32, %v802_v53  ;;  %v2946_v48 = vpack.c.bf16 %v998_v57, %v995_v62 }
 0x1d6   : > { %2978 = vst [vmem:[#allocation3 + $0x58] sm:$0xff] %v2851_v2   ;;  %2996 = vst [vmem:[#allocation4 + $0x70] sm:$0xff] %v2946_v48  }
 0x1d7 PF: > { %v3303_v58 = vld [vmem:[#allocation3 + $0x78] sm:$0xff]   ;;  %v3305_v60 = vld [vmem:[#allocation3 + $0x70] sm:$0xff]   ;;  %s2567_s11 = sshll.u32 %s3545_s15, 7  ;;  %v3307_v0 = vld [vmem:[#allocation3 + $0x68] sm:$0xff]   ;;  %s2610_s29 = sshll.u32 %s3545_s15, 4 }
 0x1d8   : > { %v3304_v59 = vld [vmem:[#allocation3 + $0x38] sm:$0xff]   ;;  %3022 = vmatprep.subr.bf16.mxu0 %v3303_v58  ;;  %v3306_v61 = vld [vmem:[#allocation3 + $0x30] sm:$0xff]   ;;  %s1491_s20 = sshra.s32 %s2567_s11, 3  ;;  %v3308_v63 = vld [vmem:[#allocation3 + $0x28] sm:$0xff]   ;;  %s3958_s28 = scalar_lea.vmem %s3698_s30, %s2567_s11 }
 0x1d9   : > { %3023 = vmatpush3.bf16.xpose.msra.mxu0 %v3304_v59  ;;  %s2568_s21 = sshll.u32 %s1491_s20, 2  ;;  %v3309_v1 = vld [vmem:[#allocation3 + $0x60] sm:$0xff]   ;;  %v3312_v6 = vld [vmem:[#allocation3 + $0x18] sm:$0xff]   ;;  %v3313_v7 = vld [vmem:[#allocation3 + $0x50] sm:$0xff]   ;;  %s2611_s6 = sshll.u32 %s3549_s16, 5 }
 0x1da   : > { %3024 = vmatprep.subr.bf16.mxu0 %v3305_v60  ;;  %s3817_s25 = scalar_lea.vmem [#allocation2], %s2568_s21  ;;  %v3310_v4 = vld [vmem:[#allocation3 + $0x20] sm:$0xff]   ;;  %v3314_v8 = vld [vmem:[#allocation3 + $0x10] sm:$0xff]   ;;  %v3315_v9 = vld [vmem:[#allocation3 + $0x48] sm:$0xff]   ;;  %s2327_s7 = sadd.s32 %s2611_s6, %s2610_s29 }
 0x1db   : > { %v3319_v3 = vld [vmem:[%s3817_s25] sm:$0xff]   ;;  %v3316_v10 = vld [vmem:[#allocation3 + $0x8] sm:$0xff]   ;;  %v3321_v14 = vld [vmem:[%s3817_s25 + $0x10] sm:$0xff]   ;;  %s2612_s30 = sshll.u32 %s2327_s7, 7  ;;  %s2330_s15 = sshll.u32 %s3705_s10, 4  ;;  %s3999_s15 = int_to_ptr.vmem [resolvable:$true] %s2330_s15 }
 0x1dc   : > { %3038 = vmatprep.mubr.bf16.mxu0 %v3319_v3  ;;  %v3317_v11 = vld [vmem:[#allocation3 + $0x40] sm:$0xff]   ;;  %v3320_v13 = vld [vmem:[%s3817_s25 + $0x8] sm:$0xff]   ;;  %v3322_v15 = vld [vmem:[%s3817_s25 + $0x18] sm:$0xff]   ;;  %s3997_s9 = scalar_lea.hbm %s4058_s3, %s2612_s30  ;;  %s4004_s4 = scalar_lea.sflag [#allocation7], %s205_s24 }
 0x1dd   : > { %v3311_v5 = vld [vmem:[#allocation3 + $0x58] sm:$0xff]   ;;  %v3318_v12 = vld [vmem:[#allocation3] sm:$0xff]   ;;  %v3324_v18 = vld [vmem:[%s3817_s25 + $0x28] sm:$0xff]   ;;  %s3465_s11 = scalar_lea.vmem %s3999_s15, 2048  ;;  %s3567_s20 = smov [#allocation8]  }
 0x1de   : > { %v3323_v17 = vld [vmem:[%s3817_s25 + $0x20] sm:$0xff]   ;;  %v3325_v19 = vld [vmem:[%s3817_s25 + $0x30] sm:$0xff]   ;;  %v3326_v20 = vld [vmem:[%s3817_s25 + $0x38] sm:$0xff]   ;;  %p3466_p12 = scmp.ne.s32.totalorder %s3999_s15, %s3465_s11  ;;  %s3469_s21 = sshll.u32 %s3567_s20, 4  ;;  %s3470_s21 = int_to_ptr.vmem [resolvable:$false] %s3469_s21 }
 0x1df   : > { %v3327_v21 = vld [vmem:[#allocation4 + $0x78] sm:$0xff]   ;;  %v3329_v23 = vld [vmem:[#allocation4 + $0x70] sm:$0xff]   ;;  %v3331_v38 = vld [vmem:[#allocation4 + $0x68] sm:$0xff]   ;;  %s3471_s25 = scalar_lea.vmem %s3470_s21, 4096  ;;  %p3472_p2 = scmp.lt.s32.totalorder %s3999_s15, %s3470_s21 }
 0x1e0   : > { %v3328_v22 = vld [vmem:[#allocation4 + $0x38] sm:$0xff]   ;;  %3054 = vmatprep.subr.bf16.mxu1 %v3327_v21  ;;  %v3330_v24 = vld [vmem:[#allocation4 + $0x30] sm:$0xff]   ;;  %v3332_v40 = vld [vmem:[#allocation4 + $0x28] sm:$0xff]   ;;  %p3467_p0 = pnand %p3466_p12, %p3642_p3  ;;  %p3473_p4 = scmp.lt.s32.totalorder %s3471_s25, %s3465_s11 }
 0x1e1   : > { %3025 = vmatpush3.bf16.xpose.msra.mxu0 %v3306_v61  ;;  %3055 = vmatpush3.bf16.msra.mxu1 %v3328_v22  ;;  %v3333_v43 = vld [vmem:[#allocation4 + $0x60] sm:$0xff]   ;;  %v3335_v49 = vld [vmem:[#allocation4 + $0x58] sm:$0xff]   ;;  %v3337_v62 = vld [vmem:[#allocation4 + $0x50] sm:$0xff]  }
 0x1e2   : > { %3026 = vmatprep.subr.bf16.mxu0 %v3307_v0  ;;  %3056 = vmatprep.subr.bf16.mxu1 %v3329_v23  ;;  %v3334_v45 = vld [vmem:[#allocation4 + $0x20] sm:$0xff]   ;;  %v3336_v51 = vld [vmem:[#allocation4 + $0x18] sm:$0xff]   ;;  %v3338_v55 = vld [vmem:[#allocation4 + $0x10] sm:$0xff]   ;;  %p3468_p1 = pneg %p3467_p0  ;;  %p3474_p5 = por %p3473_p4, %p3472_p2 }
 0x1e3   : > { %v3339_v32 = vld [vmem:[#allocation4 + $0x48] sm:$0xff]   ;;  %v3341_v59 = vld [vmem:[#allocation4 + $0x40] sm:$0xff]  }
 0x1e4   : > { %v3340_v2 = vld [vmem:[#allocation4 + $0x8] sm:$0xff]   ;;  %v3342_v61 = vld [vmem:[#allocation4] sm:$0xff]   ;;  %p3475_p6 = pnand %p3474_p5, %p3468_p1 }
 0x1e5   : > { %3057 = vmatpush3.bf16.msra.mxu1 %v3330_v24 }
 0x1e6   : > { %3058 = vmatprep.subr.bf16.mxu1 %v3331_v38 }
 0x1e9   : > { %3027 = vmatpush3.bf16.xpose.msra.mxu0 %v3308_v63  ;;  %3059 = vmatpush3.bf16.msra.mxu1 %v3332_v40 }
 0x1ea   : > { %3028 = vmatprep.subr.bf16.mxu0 %v3309_v1  ;;  %3060 = vmatprep.subr.bf16.mxu1 %v3333_v43 }
 0x1ed   : > { %3061 = vmatpush3.bf16.msra.mxu1 %v3334_v45 }
 0x1ee   : > { %3062 = vmatprep.subr.bf16.mxu1 %v3335_v49 }
 0x1f1   : > { %3029 = vmatpush3.bf16.xpose.msra.mxu0 %v3310_v4  ;;  %3063 = vmatpush3.bf16.msra.mxu1 %v3336_v51 }
 0x1f2   : > { %3030 = vmatprep.subr.bf16.mxu0 %v3311_v5  ;;  %3064 = vmatprep.subr.bf16.mxu1 %v3337_v62 }
 0x1f5   : > { %3065 = vmatpush3.bf16.msra.mxu1 %v3338_v55 }
 0x1f6   : > { %3066 = vmatprep.subr.bf16.mxu1 %v3339_v32 }
 0x1f9   : > { %3031 = vmatpush3.bf16.xpose.msra.mxu0 %v3312_v6  ;;  %3067 = vmatpush3.bf16.msra.mxu1 %v3340_v2 }
 0x1fa   : > { %3032 = vmatprep.subr.bf16.mxu0 %v3313_v7  ;;  %3068 = vmatprep.subr.bf16.mxu1 %v3341_v59 }
 0x1fd   : > { %3069 = vmatpush3.bf16.msra.mxu1 %v3342_v61 }
 0x201   : > { %3033 = vmatpush3.bf16.xpose.msra.mxu0 %v3314_v8 }
 0x202   : > { %3034 = vmatprep.subr.bf16.mxu0 %v3315_v9 }
 0x209   : > { %3035 = vmatpush3.bf16.xpose.msra.mxu0 %v3316_v10 }
 0x20a   : > { %3036 = vmatprep.subr.bf16.mxu0 %v3317_v11 }
 0x211   : > { %3037 = vmatpush3.bf16.xpose.msra.mxu0 %v3318_v12 }
 0x218   : > { %3039 = vmatmul.mubr.bf16.vlgmr.msra.gmra.mxu0 %v3319_v3 }
 0x219   : > { %3040 = vmatprep.mubr.bf16.mxu0 %v3320_v13 }
 0x220   : > { %3041 = vmatmul.mubr.bf16.gmra.mxu0 %v3320_v13 }
 0x221   : > { %3042 = vmatprep.mubr.bf16.mxu0 %v3321_v14 }
 0x228   : > { %3043 = vmatmul.mubr.bf16.gmra.mxu0 %v3321_v14 }
 0x229   : > { %3044 = vmatprep.mubr.bf16.mxu0 %v3322_v15 }
 0x230   : > { %3045 = vmatmul.mubr.bf16.gmra.mxu0 %v3322_v15 }
 0x231   : > { %3046 = vmatprep.mubr.bf16.mxu0 %v3323_v17 }
 0x238   : > { %3047 = vmatmul.mubr.bf16.gmra.mxu0 %v3323_v17 }
 0x239   : > { %3048 = vmatprep.mubr.bf16.mxu0 %v3324_v18 }
 0x240   : > { %3049 = vmatmul.mubr.bf16.gmra.mxu0 %v3324_v18 }
 0x241   : > { %3050 = vmatprep.mubr.bf16.mxu0 %v3325_v19 }
 0x248   : > { %3051 = vmatmul.mubr.bf16.gmra.mxu0 %v3325_v19 }
 0x249   : > { %3052 = vmatprep.mubr.bf16.mxu0 %v3326_v20 }
 0x250   : > { %3053 = vmatmul.mubr.bf16.gmra.mxu0 %v3326_v20 }
 0x2d8   : > { %v3827_v25 = vpop.f32.mrf.mxu0 }
 0x2da   : > { %v3829_v26 = vpop.f32.mrf.mxu0 }
 0x2db   : > { %v1800_v27 = vmax.f32 %v3827_v25, %v3829_v26 }
 0x2dc   : > { %v3833_v28 = vpop.f32.mrf.mxu0 }
 0x2dd   : > { %1801 = vmax.xlane.f32.xlu0 %v1800_v27 }
 0x2de   : > { %v3835_v29 = vpop.f32.mrf.mxu0 }
 0x2df   : > { %v1803_v30 = vmax.f32 %v3833_v28, %v3835_v29 }
 0x2e0   : > { %v3839_v31 = vpop.f32.mrf.mxu0 }
 0x2e1   : > { %1804 = vmax.xlane.f32.xlu0 %v1803_v30 }
 0x2e2   : > { %v3841_v33 = vpop.f32.mrf.mxu0 }
 0x2e3   : > { %v1806_v34 = vmax.f32 %v3839_v31, %v3841_v33 }
 0x2e4   : > { %v3845_v35 = vpop.f32.mrf.mxu0 }
 0x2e5   : > { %1807 = vmax.xlane.f32.xlu1 %v1806_v34 }
 0x2e6   : > { %v3847_v36 = vpop.f32.mrf.mxu0 }
 0x2e7   : > { %v1809_v37 = vmax.f32 %v3845_v35, %v3847_v36 }
 0x2e8   : > { %v3851_v39 = vpop.f32.mrf.mxu0 }
 0x2e9   : > { %1810 = vmax.xlane.f32.xlu1 %v1809_v37 }
 0x2ea   : > { %v3853_v41 = vpop.f32.mrf.mxu0 }
 0x2eb   : > { %v1812_v42 = vmax.f32 %v3851_v39, %v3853_v41 }
 0x2ec   : > { %v3857_v44 = vpop.f32.mrf.mxu0 }
 0x2ed   : > { %1813 = vmax.xlane.f32.xlu0 %v1812_v42 }
 0x2ee   : > { %v3859_v46 = vpop.f32.mrf.mxu0 }
 0x2ef   : > { %v1815_v47 = vmax.f32 %v3857_v44, %v3859_v46 }
 0x2f0   : > { %v3863_v50 = vpop.f32.mrf.mxu0 }
 0x2f1   : > { %1816 = vmax.xlane.f32.xlu1 %v1815_v47 }
 0x2f2   : > { %v3865_v52 = vpop.f32.mrf.mxu0 }
 0x2f3   : > { %v1818_v53 = vmax.f32 %v3863_v50, %v3865_v52 }
 0x2f4   : > { %v3869_v54 = vpop.f32.mrf.mxu0 }
 0x2f5   : > { %1819 = vmax.xlane.f32.xlu0 %v1818_v53 }
 0x2f6   : > { %v3871_v16 = vpop.f32.mrf.mxu0 }
 0x2f7   : > { %v1821_v56 = vmax.f32 %v3869_v54, %v3871_v16 }
 0x2f8   : > { %v3875_v57 = vpop.f32.mrf.mxu0 }
 0x2f9   : > { %1822 = vmax.xlane.f32.xlu1 %v1821_v56 }
 0x2fa   : > { %v3877_v48 = vpop.f32.mrf.mxu0 }
 0x2fb   : > { %v1824_v58 = vmax.f32 %v3875_v57, %v3877_v48 }
 0x2fc   : > { %v3881_v60 = vpop.f32.mrf.mxu0 }
 0x2fd   : > { %1825 = vmax.xlane.f32.xlu0 %v1824_v58 }
 0x2fe   : > { %v3883_v0 = vpop.f32.mrf.mxu0 }
 0x2ff   : > { %v1827_v63 = vmax.f32 %v3881_v60, %v3883_v0 }
 0x300   : > { %v3887_v1 = vpop.f32.mrf.mxu0 }
 0x301   : > { %1828 = vmax.xlane.f32.xlu1 %v1827_v63 }
 0x302   : > { %v3889_v3 = vpop.f32.mrf.mxu0 }
 0x303   : > { %v1830_v4 = vmax.f32 %v3887_v1, %v3889_v3 }
 0x304   : > { %v3893_v5 = vpop.f32.mrf.mxu0 }
 0x305   : > { %1831 = vmax.xlane.f32.xlu0 %v1830_v4 }
 0x306   : > { %v3895_v6 = vpop.f32.mrf.mxu0 }
 0x307   : > { %v1833_v7 = vmax.f32 %v3893_v5, %v3895_v6 }
 0x308   : > { %v3899_v8 = vpop.f32.mrf.mxu0 }
 0x309   : > { %1834 = vmax.xlane.f32.xlu1 %v1833_v7 }
 0x30a   : > { %v3901_v9 = vpop.f32.mrf.mxu0 }
 0x30b   : > { %v1836_v10 = vmax.f32 %v3899_v8, %v3901_v9 }
 0x30c   : > { %v3905_v11 = vpop.f32.mrf.mxu0 }
 0x30d   : > { %1837 = vmax.xlane.f32.xlu0 %v1836_v10 }
 0x30e   : > { %v3907_v12 = vpop.f32.mrf.mxu0 }
 0x30f   : > { %v1839_v13 = vmax.f32 %v3905_v11, %v3907_v12 }
 0x310   : > { %v3911_v14 = vpop.f32.mrf.mxu0 }
 0x311   : > { %1840 = vmax.xlane.f32.xlu1 %v1839_v13 }
 0x312   : > { %v3913_v15 = vpop.f32.mrf.mxu0 }
 0x313   : > { %v1842_v17 = vmax.f32 %v3911_v14, %v3913_v15 }
 0x314   : > { %v3917_v18 = vpop.f32.mrf.mxu0 }
 0x315   : > { %1843 = vmax.xlane.f32.xlu0 %v1842_v17 }
 0x316   : > { %v3919_v19 = vpop.f32.mrf.mxu0 }
 0x317   : > { %v1845_v20 = vmax.f32 %v3917_v18, %v3919_v19 }
 0x319   : > { %1846 = vmax.xlane.f32.xlu1 %v1845_v20 }
 0x366   : > { %v1802_v21 = vpop.xlane.xlu0 %1801 }
 0x367   : > { %v1848_v22 = vsub.f32 %v3827_v25, %v1802_v21  ;;  %v1849_v23 = vsub.f32 %v3829_v26, %v1802_v21 }
 0x369   : > { %v1880_v24 = vmul.f32 1.442695, %v1848_v22  ;;  %v1882_v27 = vmul.f32 1.442695, %v1849_v23 }
 0x36a   : > { %v1805_v30 = vpop.xlane.xlu0 %1804 }
 0x36b   : > { %3343 = vpow2.f32 %v1880_v24  ;;  %v1850_v34 = vsub.f32 %v3833_v28, %v1805_v30  ;;  %v1851_v37 = vsub.f32 %v3835_v29, %v1805_v30 }
 0x36c   : > { %3345 = vpow2.f32 %v1882_v27 }
 0x36d   : > { %v1884_v38 = vmul.f32 1.442695, %v1850_v34  ;;  %v1886_v40 = vmul.f32 1.442695, %v1851_v37 }
 0x36e   : > { %v1808_v42 = vpop.xlane.xlu1 %1807 }
 0x36f   : > { %3347 = vpow2.f32 %v1884_v38  ;;  %v1852_v43 = vsub.f32 %v3839_v31, %v1808_v42  ;;  %v1853_v45 = vsub.f32 %v3841_v33, %v1808_v42 }
 0x370   : > { %3349 = vpow2.f32 %v1886_v40 }
 0x371   : > { %v1888_v25 = vmul.f32 1.442695, %v1852_v43  ;;  %v1890_v26 = vmul.f32 1.442695, %v1853_v45 }
 0x372   : > { %v1811_v47 = vpop.xlane.xlu1 %1810 }
 0x373   : > { %3351 = vpow2.f32 %v1888_v25  ;;  %v1854_v49 = vsub.f32 %v3845_v35, %v1811_v47  ;;  %v1855_v28 = vsub.f32 %v3847_v36, %v1811_v47 }
 0x374   : > { %3353 = vpow2.f32 %v1890_v26 }
 0x375   : > { %v1892_v29 = vmul.f32 1.442695, %v1854_v49  ;;  %v1894_v51 = vmul.f32 1.442695, %v1855_v28 }
 0x376   : > { %v1814_v53 = vpop.xlane.xlu0 %1813 }
 0x377   : > { %3355 = vpow2.f32 %v1892_v29  ;;  %v1856_v62 = vsub.f32 %v3851_v39, %v1814_v53  ;;  %v1857_v31 = vsub.f32 %v3853_v41, %v1814_v53 }
 0x378   : > { %v3344_v55 = vpop.eup %3343  ;;  %3357 = vpow2.f32 %v1894_v51 }
 0x379   : > { %v3346_v33 = vpop.eup %3345  ;;  %v1896_v56 = vmul.f32 1.442695, %v1856_v62  ;;  %v1898_v32 = vmul.f32 1.442695, %v1857_v31 }
 0x37a   : > { %v1817_v2 = vpop.xlane.xlu1 %1816  ;;  %v1944_v58 = vadd.f32 %v3346_v33, %v3344_v55 }
 0x37b   : > { %3359 = vpow2.f32 %v1896_v56  ;;  %v1858_v35 = vsub.f32 %v3857_v44, %v1817_v2  ;;  %v1859_v36 = vsub.f32 %v3859_v46, %v1817_v2 }
 0x37c   : > { %v3348_v59 = vpop.eup %3347  ;;  %3361 = vpow2.f32 %v1898_v32  ;;  %1945 = vadd.xlane.f32.xlu0 %v1944_v58 }
 0x37d   : > { %v3350_v61 = vpop.eup %3349  ;;  %v1900_v63 = vmul.f32 1.442695, %v1858_v35  ;;  %v1902_v39 = vmul.f32 1.442695, %v1859_v36  ;;  %v1992_v4 = vpack.c.bf16 %v3348_v59, %v3344_v55 }
 0x37e   : > { %v1820_v41 = vpop.xlane.xlu0 %1819  ;;  %v1993_v7 = vpack.c.bf16 %v3350_v61, %v3346_v33  ;;  %v1947_v10 = vadd.f32 %v3350_v61, %v3348_v59 }
 0x37f   : > { %3363 = vpow2.f32 %v1900_v63  ;;  %v1860_v13 = vsub.f32 %v3863_v50, %v1820_v41  ;;  %v1861_v17 = vsub.f32 %v3865_v52, %v1820_v41 }
 0x380   : > { %v3352_v20 = vpop.eup %3351  ;;  %3365 = vpow2.f32 %v1902_v39  ;;  %2168 = vmatprep.mubr.bf16.mxu1 %v1993_v7  ;;  %1948 = vadd.xlane.f32.xlu1 %v1947_v10 }
 0x381   : > { %v3354_v44 = vpop.eup %3353  ;;  %v1904_v46 = vmul.f32 1.442695, %v1860_v13  ;;  %v1906_v21 = vmul.f32 1.442695, %v1861_v17  ;;  %2169 = vmatmul.mubr.bf16.vlgmr.msra.gmra.mxu1 %v1992_v4 }
 0x382   : > { %v1823_v22 = vpop.xlane.xlu1 %1822  ;;  %v1950_v23 = vadd.f32 %v3354_v44, %v3352_v20 }
 0x383   : > { %3367 = vpow2.f32 %v1904_v46  ;;  %v1862_v24 = vsub.f32 %v3869_v54, %v1823_v22  ;;  %v1863_v27 = vsub.f32 %v3871_v16, %v1823_v22 }
 0x384   : > { %v3356_v30 = vpop.eup %3355  ;;  %3369 = vpow2.f32 %v1906_v21  ;;  %1951 = vadd.xlane.f32.xlu0 %v1950_v23 }
 0x385   : > { %v3358_v50 = vpop.eup %3357  ;;  %v1908_v52 = vmul.f32 1.442695, %v1862_v24  ;;  %v1910_v34 = vmul.f32 1.442695, %v1863_v27  ;;  %v1994_v37 = vpack.c.bf16 %v3356_v30, %v3352_v20 }
 0x386   : > { %v1826_v38 = vpop.xlane.xlu0 %1825  ;;  %v1995_v40 = vpack.c.bf16 %v3358_v50, %v3354_v44  ;;  %v1953_v42 = vadd.f32 %v3358_v50, %v3356_v30 }
 0x387   : > { %3371 = vpow2.f32 %v1908_v52  ;;  %v1864_v43 = vsub.f32 %v3875_v57, %v1826_v38  ;;  %v1865_v45 = vsub.f32 %v3877_v48, %v1826_v38 }
 0x388   : > { %v3360_v25 = vpop.eup %3359  ;;  %3373 = vpow2.f32 %v1910_v34  ;;  %2176 = vmatprep.mubr.bf16.mxu1 %v1995_v40  ;;  %1954 = vadd.xlane.f32.xlu1 %v1953_v42 }
 0x389   : > { %v3362_v54 = vpop.eup %3361  ;;  %v1912_v16 = vmul.f32 1.442695, %v1864_v43  ;;  %v1914_v26 = vmul.f32 1.442695, %v1865_v45  ;;  %2177 = vmatmul.mubr.bf16.gmra.mxu1 %v1994_v37 }
 0x38a   : > { %v1829_v47 = vpop.xlane.xlu1 %1828  ;;  %v1956_v49 = vadd.f32 %v3362_v54, %v3360_v25 }
 0x38b   : > { %3375 = vpow2.f32 %v1912_v16  ;;  %v1866_v28 = vsub.f32 %v3881_v60, %v1829_v47  ;;  %v1867_v29 = vsub.f32 %v3883_v0, %v1829_v47 }
 0x38c   : > { %v3364_v51 = vpop.eup %3363  ;;  %3377 = vpow2.f32 %v1914_v26  ;;  %1957 = vadd.xlane.f32.xlu0 %v1956_v49 }
 0x38d   : > { %v3366_v57 = vpop.eup %3365  ;;  %v1916_v48 = vmul.f32 1.442695, %v1866_v28  ;;  %v1918_v53 = vmul.f32 1.442695, %v1867_v29  ;;  %v1996_v62 = vpack.c.bf16 %v3364_v51, %v3360_v25 }
 0x38e   : > { %v1832_v31 = vpop.xlane.xlu0 %1831  ;;  %v1997_v55 = vpack.c.bf16 %v3366_v57, %v3362_v54  ;;  %v1959_v33 = vadd.f32 %v3366_v57, %v3364_v51 }
 0x38f   : > { %3379 = vpow2.f32 %v1916_v48  ;;  %v1868_v56 = vsub.f32 %v3887_v1, %v1832_v31  ;;  %v1869_v32 = vsub.f32 %v3889_v3, %v1832_v31 }
 0x390   : > { %v3368_v2 = vpop.eup %3367  ;;  %3381 = vpow2.f32 %v1918_v53  ;;  %2184 = vmatprep.mubr.bf16.mxu1 %v1997_v55  ;;  %1960 = vadd.xlane.f32.xlu1 %v1959_v33 }
 0x391   : > { %v3370_v60 = vpop.eup %3369  ;;  %v1920_v0 = vmul.f32 1.442695, %v1868_v56  ;;  %v1922_v58 = vmul.f32 1.442695, %v1869_v32  ;;  %2185 = vmatmul.mubr.bf16.gmra.mxu1 %v1996_v62 }
 0x392   : > { %v1835_v35 = vpop.xlane.xlu1 %1834  ;;  %v1962_v36 = vadd.f32 %v3370_v60, %v3368_v2 }
 0x393   : > { %3383 = vpow2.f32 %v1920_v0  ;;  %v1870_v59 = vsub.f32 %v3893_v5, %v1835_v35  ;;  %v1871_v61 = vsub.f32 %v3895_v6, %v1835_v35 }
 0x394   : > { %v3372_v63 = vpop.eup %3371  ;;  %3385 = vpow2.f32 %v1922_v58  ;;  %1963 = vadd.xlane.f32.xlu0 %v1962_v36 }
 0x395   : > { %v3374_v1 = vpop.eup %3373  ;;  %v1924_v3 = vmul.f32 1.442695, %v1870_v59  ;;  %v1926_v39 = vmul.f32 1.442695, %v1871_v61  ;;  %v1998_v4 = vpack.c.bf16 %v3372_v63, %v3368_v2 }
 0x396   : > { %v1838_v41 = vpop.xlane.xlu0 %1837  ;;  %v1999_v7 = vpack.c.bf16 %v3374_v1, %v3370_v60  ;;  %v1965_v10 = vadd.f32 %v3374_v1, %v3372_v63 }
 0x397   : > { %3387 = vpow2.f32 %v1924_v3  ;;  %v1872_v13 = vsub.f32 %v3899_v8, %v1838_v41  ;;  %v1873_v17 = vsub.f32 %v3901_v9, %v1838_v41 }
 0x398   : > { %v3376_v20 = vpop.eup %3375  ;;  %3389 = vpow2.f32 %v1926_v39  ;;  %2192 = vmatprep.mubr.bf16.mxu1 %v1999_v7  ;;  %1966 = vadd.xlane.f32.xlu1 %v1965_v10 }
 0x399   : > { %v3378_v5 = vpop.eup %3377  ;;  %v1928_v6 = vmul.f32 1.442695, %v1872_v13  ;;  %v1930_v44 = vmul.f32 1.442695, %v1873_v17  ;;  %2193 = vmatmul.mubr.bf16.gmra.mxu1 %v1998_v4  ;;  %v2234_v4 = vld [vmem:[%s3958_s28] sm:$0xff] }
 0x39a   : > { %v1841_v46 = vpop.xlane.xlu1 %1840  ;;  %v1968_v21 = vadd.f32 %v3378_v5, %v3376_v20 }
 0x39b   : > { %3391 = vpow2.f32 %v1928_v6  ;;  %v1874_v22 = vsub.f32 %v3905_v11, %v1841_v46  ;;  %v1875_v23 = vsub.f32 %v3907_v12, %v1841_v46  ;;  %v2235_v6 = vld [vmem:[%s3958_s28 + $0x8] sm:$0xff] }
 0x39c   : > { %v3380_v24 = vpop.eup %3379  ;;  %3393 = vpow2.f32 %v1930_v44  ;;  %1969 = vadd.xlane.f32.xlu0 %v1968_v21 }
 0x39d   : > { %v3382_v8 = vpop.eup %3381  ;;  %v1932_v9 = vmul.f32 1.442695, %v1874_v22  ;;  %v1934_v27 = vmul.f32 1.442695, %v1875_v23  ;;  %v2000_v30 = vpack.c.bf16 %v3380_v24, %v3376_v20 }
 0x39e   : > { %v1844_v50 = vpop.xlane.xlu0 %1843  ;;  %v2001_v52 = vpack.c.bf16 %v3382_v8, %v3378_v5  ;;  %v1971_v34 = vadd.f32 %v3382_v8, %v3380_v24 }
 0x39f   : > { %3395 = vpow2.f32 %v1932_v9  ;;  %v1876_v37 = vsub.f32 %v3911_v14, %v1844_v50  ;;  %v1877_v38 = vsub.f32 %v3913_v15, %v1844_v50  ;;  %v2236_v9 = vld [vmem:[%s3958_s28 + $0x10] sm:$0xff] }
 0x3a0   : > { %v3384_v40 = vpop.eup %3383  ;;  %3397 = vpow2.f32 %v1934_v27  ;;  %2200 = vmatprep.mubr.bf16.mxu1 %v2001_v52  ;;  %1972 = vadd.xlane.f32.xlu1 %v1971_v34 }
 0x3a1   : > { %v3386_v11 = vpop.eup %3385  ;;  %v1936_v12 = vmul.f32 1.442695, %v1876_v37  ;;  %v1938_v42 = vmul.f32 1.442695, %v1877_v38  ;;  %2201 = vmatmul.mubr.bf16.gmra.mxu1 %v2000_v30 }
 0x3a2   : > { %v1847_v43 = vpop.xlane.xlu1 %1846  ;;  %v1974_v45 = vadd.f32 %v3386_v11, %v3384_v40 }
 0x3a3   : > { %3399 = vpow2.f32 %v1936_v12  ;;  %v1878_v25 = vsub.f32 %v3917_v18, %v1847_v43  ;;  %v1879_v54 = vsub.f32 %v3919_v19, %v1847_v43 }
 0x3a4   : > { %v3388_v16 = vpop.eup %3387  ;;  %3401 = vpow2.f32 %v1938_v42  ;;  %1975 = vadd.xlane.f32.xlu0 %v1974_v45 }
 0x3a5   : > { %v3390_v14 = vpop.eup %3389  ;;  %v1940_v15 = vmul.f32 1.442695, %v1878_v25  ;;  %v1942_v26 = vmul.f32 1.442695, %v1879_v54  ;;  %v2002_v47 = vpack.c.bf16 %v3388_v16, %v3384_v40  ;;  %v2237_v40 = vld [vmem:[%s3958_s28 + $0x18] sm:$0xff] }
 0x3a6   : > { %v2003_v49 = vpack.c.bf16 %v3390_v14, %v3386_v11  ;;  %v1977_v28 = vadd.f32 %v3390_v14, %v3388_v16  ;;  %v2238_v16 = vld [vmem:[%s3958_s28 + $0x20] sm:$0xff] }
 0x3a7   : > { %3403 = vpow2.f32 %v1940_v15 }
 0x3a8   : > { %v3392_v29 = vpop.eup %3391  ;;  %3405 = vpow2.f32 %v1942_v26  ;;  %2208 = vmatprep.mubr.bf16.mxu1 %v2003_v49  ;;  %1978 = vadd.xlane.f32.xlu1 %v1977_v28 }
 0x3a9   : > { %v3394_v51 = vpop.eup %3393  ;;  %2209 = vmatmul.mubr.bf16.gmra.mxu1 %v2002_v47 }
 0x3aa   : > { %v1980_v57 = vadd.f32 %v3394_v51, %v3392_v29 }
 0x3ac   : > { %v3396_v18 = vpop.eup %3395  ;;  %1981 = vadd.xlane.f32.xlu0 %v1980_v57 }
 0x3ad   : > { %v3398_v19 = vpop.eup %3397  ;;  %v2004_v48 = vpack.c.bf16 %v3396_v18, %v3392_v29 }
 0x3ae   : > { %v2005_v53 = vpack.c.bf16 %v3398_v19, %v3394_v51  ;;  %v1983_v62 = vadd.f32 %v3398_v19, %v3396_v18  ;;  %v2239_v51 = vld [vmem:[%s3958_s28 + $0x28] sm:$0xff] }
 0x3b0   : > { %v3400_v31 = vpop.eup %3399  ;;  %2216 = vmatprep.mubr.bf16.mxu1 %v2005_v53  ;;  %1984 = vadd.xlane.f32.xlu1 %v1983_v62 }
 0x3b1   : > { %v3402_v55 = vpop.eup %3401  ;;  %2217 = vmatmul.mubr.bf16.gmra.mxu1 %v2004_v48 }
 0x3b2   : > { %v1986_v33 = vadd.f32 %v3402_v55, %v3400_v31 }
 0x3b4   : > { %v3404_v56 = vpop.eup %3403  ;;  %1987 = vadd.xlane.f32.xlu0 %v1986_v33 }
 0x3b5   : > { %v3406_v32 = vpop.eup %3405  ;;  %v2006_v2 = vpack.c.bf16 %v3404_v56, %v3400_v31 }
 0x3b6   : > { %v2007_v60 = vpack.c.bf16 %v3406_v32, %v3402_v55  ;;  %v1989_v0 = vadd.f32 %v3406_v32, %v3404_v56  ;;  %v2240_v55 = vld [vmem:[%s3958_s28 + $0x30] sm:$0xff] }
 0x3b8   : > { %2224 = vmatprep.mubr.bf16.mxu1 %v2007_v60  ;;  %1990 = vadd.xlane.f32.xlu1 %v1989_v0 }
 0x3b9   : > { %2225 = vmatmul.mubr.bf16.gmra.mxu1 %v2006_v2 }
 0x405   : > { %v1946_v58 = vpop.xlane.xlu0 %1945 }
 0x406   : > { %3407 = vrcp.f32 %v1946_v58 }
 0x409   : > { %v1949_v35 = vpop.xlane.xlu1 %1948 }
 0x40a   : > { %3409 = vrcp.f32 %v1949_v35  ;;  %v2241_v35 = vld [vmem:[%s3958_s28 + $0x38] sm:$0xff] }
 0x40d   : > { %v1952_v36 = vpop.xlane.xlu0 %1951 }
 0x40e   : > { %3411 = vrcp.f32 %v1952_v36 }
 0x411   : > { %v1955_v59 = vpop.xlane.xlu1 %1954 }
 0x412   : > { %3413 = vrcp.f32 %v1955_v59 }
 0x413   : > { %v3408_v3 = vpop.eup %3407 }
 0x415   : > { %v1958_v39 = vpop.xlane.xlu0 %1957 }
 0x416   : > { %3415 = vrcp.f32 %v1958_v39 }
 0x417   : > { %v3410_v20 = vpop.eup %3409 }
 0x419   : > { %v1961_v5 = vpop.xlane.xlu1 %1960 }
 0x41a   : > { %3417 = vrcp.f32 %v1961_v5 }
 0x41b   : > { %v3412_v24 = vpop.eup %3411 }
 0x41d   : > { %v1964_v8 = vpop.xlane.xlu0 %1963 }
 0x41e   : > { %3419 = vrcp.f32 %v1964_v8 }
 0x41f   : > { %v3414_v37 = vpop.eup %3413 }
 0x421   : > { %v1967_v38 = vpop.xlane.xlu1 %1966 }
 0x422   : > { %3421 = vrcp.f32 %v1967_v38 }
 0x423   : > { %v3416_v25 = vpop.eup %3415 }
 0x425   : > { %v1970_v54 = vpop.xlane.xlu0 %1969 }
 0x426   : > { %3423 = vrcp.f32 %v1970_v54  ;;  %v2246_v54 = vld [vmem:[%s3958_s28 + $0x60] sm:$0xff] }
 0x427   : > { %v3418_v28 = vpop.eup %3417 }
 0x429   : > { %v1973_v29 = vpop.xlane.xlu1 %1972 }
 0x42a   : > { %3425 = vrcp.f32 %v1973_v29 }
 0x42b   : > { %v3420_v62 = vpop.eup %3419 }
 0x42d   : > { %v1976_v31 = vpop.xlane.xlu0 %1975 }
 0x42e   : > { %3427 = vrcp.f32 %v1976_v31 }
 0x42f   : > { %v3422_v0 = vpop.eup %3421 }
 0x431   : > { %v1979_v58 = vpop.xlane.xlu1 %1978 }
 0x432   : > { %3429 = vrcp.f32 %v1979_v58 }
 0x435   : > { %v1982_v39 = vpop.xlane.xlu0 %1981 }
 0x436   : > { %3431 = vrcp.f32 %v1982_v39 }
 0x439   : > { %v1985_v5 = vpop.xlane.xlu1 %1984 }
 0x43a   : > { %3433 = vrcp.f32 %v1985_v5 }
 0x43d   : > { %v1988_v8 = vpop.xlane.xlu0 %1987 }
 0x43e   : > { %3435 = vrcp.f32 %v1988_v8 }
 0x441   : > { %v3070_v61 = vpop.f32.mrf.mxu1  ;;  %v1991_v38 = vpop.xlane.xlu1 %1990 }
 0x442   : > { %3437 = vrcp.f32 %v1991_v38 }
 0x443   : > { %v3071_v63 = vpop.f32.mrf.mxu1 }
 0x444   : > { %v3072_v1 = vadd.f32 %v3071_v63, %v3070_v61 }
 0x445   : > { %v3073_v41 = vpop.f32.mrf.mxu1 }
 0x446   : > { %v2266_v7 = vmul.f32 %v3408_v3, %v3072_v1  ;;  %v3424_v3 = vpop.eup %3423 }
 0x447   : > { %v3074_v10 = vpop.f32.mrf.mxu1 }
 0x448   : > { %v2282_v13 = vadd.f32 %v2266_v7, %v2234_v4  ;;  %v3075_v17 = vadd.f32 %v3074_v10, %v3073_v41  ;;  %v2242_v4 = vld [vmem:[%s3958_s28 + $0x40] sm:$0xff] }
 0x449   : > { %v3076_v44 = vpop.f32.mrf.mxu1 }
 0x44a   : > { %2298 = vst [vmem:[%s3705_s10] sm:$0xff] %v2282_v13  ;;  %v2267_v46 = vmul.f32 %v3410_v20, %v3075_v17  ;;  %v3426_v20 = vpop.eup %3425 }
 0x44b   : > { %v3077_v21 = vpop.f32.mrf.mxu1 }
 0x44c   : > { %v2283_v22 = vadd.f32 %v2267_v46, %v2235_v6  ;;  %v3078_v23 = vadd.f32 %v3077_v21, %v3076_v44  ;;  %v2243_v6 = vld [vmem:[%s3958_s28 + $0x48] sm:$0xff] }
 0x44d   : > { %v3079_v27 = vpop.f32.mrf.mxu1 }
 0x44e   : > { %2299 = vst [vmem:[%s3705_s10 + $0x8] sm:$0xff] %v2283_v22  ;;  %v2268_v30 = vmul.f32 %v3412_v24, %v3078_v23  ;;  %v3428_v24 = vpop.eup %3427 }
 0x44f   : > { %v3080_v50 = vpop.f32.mrf.mxu1 }
 0x450   : > { %v2284_v52 = vadd.f32 %v2268_v30, %v2236_v9  ;;  %v3081_v34 = vadd.f32 %v3080_v50, %v3079_v27  ;;  %v2244_v9 = vld [vmem:[%s3958_s28 + $0x50] sm:$0xff] }
 0x451   : > { %v3082_v11 = vpop.f32.mrf.mxu1 }
 0x452   : > { %2300 = vst [vmem:[%s3705_s10 + $0x10] sm:$0xff] %v2284_v52  ;;  %v2269_v12 = vmul.f32 %v3414_v37, %v3081_v34  ;;  %v3430_v37 = vpop.eup %3429 }
 0x453   : > { %v3083_v42 = vpop.f32.mrf.mxu1 }
 0x454   : > { %v2285_v43 = vadd.f32 %v2269_v12, %v2237_v40  ;;  %v3084_v45 = vadd.f32 %v3083_v42, %v3082_v11  ;;  %v2245_v40 = vld [vmem:[%s3958_s28 + $0x58] sm:$0xff] }
 0x455   : > { %v3085_v14 = vpop.f32.mrf.mxu1 }
 0x456   : > { %2301 = vst [vmem:[%s3705_s10 + $0x18] sm:$0xff] %v2285_v43  ;;  %v2270_v15 = vmul.f32 %v3416_v25, %v3084_v45  ;;  %v3432_v25 = vpop.eup %3431 }
 0x457   : > { %v3086_v26 = vpop.f32.mrf.mxu1 }
 0x458   : > { %v2286_v47 = vadd.f32 %v2270_v15, %v2238_v16  ;;  %v3087_v49 = vadd.f32 %v3086_v26, %v3085_v14 }
 0x459   : > { %v3088_v57 = vpop.f32.mrf.mxu1 }
 0x45a   : > { %2302 = vst [vmem:[%s3705_s10 + $0x20] sm:$0xff] %v2286_v47  ;;  %v2271_v18 = vmul.f32 %v3418_v28, %v3087_v49  ;;  %v3434_v49 = vpop.eup %3433  ;;  %v2247_v28 = vld [vmem:[%s3958_s28 + $0x68] sm:$0xff] }
 0x45b   : > { %v3089_v19 = vpop.f32.mrf.mxu1 }
 0x45c   : > { %v2287_v48 = vadd.f32 %v2271_v18, %v2239_v51  ;;  %v3090_v53 = vadd.f32 %v3089_v19, %v3088_v57 }
 0x45d   : > { %v3091_v33 = vpop.f32.mrf.mxu1 }
 0x45e   : > { %2303 = vst [vmem:[%s3705_s10 + $0x28] sm:$0xff] %v2287_v48  ;;  %v2272_v56 = vmul.f32 %v3420_v62, %v3090_v53  ;;  %v3436_v48 = vpop.eup %3435  ;;  %v2248_v53 = vld [vmem:[%s3958_s28 + $0x70] sm:$0xff] }
 0x45f   : > { %v3092_v32 = vpop.f32.mrf.mxu1 }
 0x460   : > { %v2288_v2 = vadd.f32 %v2272_v56, %v2240_v55  ;;  %v3093_v60 = vadd.f32 %v3092_v32, %v3091_v33  ;;  %v3438_v32 = vpop.eup %3437 }
 0x461   : > { %v3094_v36 = vpop.f32.mrf.mxu1 }
 0x462   : > { %2304 = vst [vmem:[%s3705_s10 + $0x30] sm:$0xff] %v2288_v2  ;;  %v2273_v59 = vmul.f32 %v3422_v0, %v3093_v60  ;;  %v2249_v2 = vld [vmem:[%s3958_s28 + $0x78] sm:$0xff] }
 0x463   : > { %v3095_v61 = vpop.f32.mrf.mxu1 }
 0x464   : > { %v2289_v63 = vadd.f32 %v2273_v59, %v2241_v35  ;;  %v3096_v1 = vadd.f32 %v3095_v61, %v3094_v36 }
 0x465   : > { %v3097_v41 = vpop.f32.mrf.mxu1 }
 0x466   : > { %2305 = vst [vmem:[%s3705_s10 + $0x38] sm:$0xff] %v2289_v63  ;;  %v2274_v7 = vmul.f32 %v3424_v3, %v3096_v1 }
 0x467   : > { %v3098_v10 = vpop.f32.mrf.mxu1 }
 0x468   : > { %v2290_v13 = vadd.f32 %v2274_v7, %v2242_v4  ;;  %v3099_v17 = vadd.f32 %v3098_v10, %v3097_v41 }
 0x469   : > { %v3100_v44 = vpop.f32.mrf.mxu1 }
 0x46a   : > { %2306 = vst [vmem:[%s3705_s10 + $0x40] sm:$0xff] %v2290_v13  ;;  %v2275_v46 = vmul.f32 %v3426_v20, %v3099_v17 }
 0x46b   : > { %v3101_v21 = vpop.f32.mrf.mxu1 }
 0x46c   : > { %v2291_v22 = vadd.f32 %v2275_v46, %v2243_v6  ;;  %v3102_v23 = vadd.f32 %v3101_v21, %v3100_v44 }
 0x46d   : > { %v3103_v27 = vpop.f32.mrf.mxu1 }
 0x46e   : > { %2307 = vst [vmem:[%s3705_s10 + $0x48] sm:$0xff] %v2291_v22  ;;  %v2276_v30 = vmul.f32 %v3428_v24, %v3102_v23 }
 0x46f   : > { %v3104_v50 = vpop.f32.mrf.mxu1 }
 0x470   : > { %v2292_v52 = vadd.f32 %v2276_v30, %v2244_v9  ;;  %v3105_v34 = vadd.f32 %v3104_v50, %v3103_v27 }
 0x471   : > { %v3106_v11 = vpop.f32.mrf.mxu1 }
 0x472   : > { %2308 = vst [vmem:[%s3705_s10 + $0x50] sm:$0xff] %v2292_v52  ;;  %v2277_v12 = vmul.f32 %v3430_v37, %v3105_v34 }
 0x473   : > { %v3107_v42 = vpop.f32.mrf.mxu1 }
 0x474   : > { %v2293_v43 = vadd.f32 %v2277_v12, %v2245_v40  ;;  %v3108_v45 = vadd.f32 %v3107_v42, %v3106_v11 }
 0x475   : > { %v3109_v16 = vpop.f32.mrf.mxu1 }
 0x476   : > { %2309 = vst [vmem:[%s3705_s10 + $0x58] sm:$0xff] %v2293_v43  ;;  %v2278_v14 = vmul.f32 %v3432_v25, %v3108_v45 }
 0x477   : > { %v3110_v15 = vpop.f32.mrf.mxu1 }
 0x478   : > { %v2294_v26 = vadd.f32 %v2278_v14, %v2246_v54  ;;  %v3111_v47 = vadd.f32 %v3110_v15, %v3109_v16 }
 0x479   : > { %v3112_v29 = vpop.f32.mrf.mxu1 }
 0x47a   : > { %2310 = vst [vmem:[%s3705_s10 + $0x60] sm:$0xff] %v2294_v26  ;;  %v2279_v51 = vmul.f32 %v3434_v49, %v3111_v47 }
 0x47b   : > { %v3113_v57 = vpop.f32.mrf.mxu1 }
 0x47c   : > { %v2295_v18 = vadd.f32 %v2279_v51, %v2247_v28  ;;  %v3114_v19 = vadd.f32 %v3113_v57, %v3112_v29 }
 0x47d   : > { %v3115_v62 = vpop.f32.mrf.mxu1 }
 0x47e   : > { %2311 = vst [vmem:[%s3705_s10 + $0x68] sm:$0xff] %v2295_v18  ;;  %v2280_v31 = vmul.f32 %v3436_v48, %v3114_v19 }
 0x47f   : > { %v3116_v55 = vpop.f32.mrf.mxu1 }
 0x480   : > { %v2296_v33 = vadd.f32 %v2280_v31, %v2248_v53  ;;  %v3117_v56 = vadd.f32 %v3116_v55, %v3115_v62 }
 0x482   : > { %2312 = vst [vmem:[%s3705_s10 + $0x70] sm:$0xff] %v2296_v33  ;;  %v2281_v60 = vmul.f32 %v3438_v32, %v3117_v56 }
 0x484   : > { %v2297_v0 = vadd.f32 %v2281_v60, %v2249_v2 }
 0x486   : > { %2313 = vst [vmem:[%s3705_s10 + $0x78] sm:$0xff] %v2297_v0 }
 0x487   : > { %3478 = shalt.err (!%p3475_p6)
}
 0x488   : > { %s3479_s24 = scalar_lea.hbm %s3997_s9, 2048  ;;  %s3483_s29 = scalar_lea.hbm %s4058_s3, 8192 }
 0x489   : > { %p3480_p7 = scmp.ne.s32.totalorder %s3997_s9, %s3479_s24  ;;  %p3484_p13 = scmp.lt.s32.totalorder %s3997_s9, %s4058_s3 }
 0x48a   : > { %p3485_p10 = scmp.lt.s32.totalorder %s3483_s29, %s3479_s24 }
 0x48b   : > { %p3481_p9 = pnand %p3480_p7, %p3642_p3 }
 0x48c   : > { %p3486_p12 = por %p3485_p10, %p3484_p13 }
 0x48d   : > { %p3482_p11 = pneg %p3481_p9 }
 0x48f   : > { %p3487_p0 = pnand %p3486_p12, %p3482_p11 }
 0x491   : > { %3490 = shalt.err (!%p3487_p0)
}
 0x492   : > { %s3568_s30 = smov 128   ;;  %s3569_s16 = smov 8  }
 0x493   : > { %3186 = dma.vmem_to_hbm [thread:$0]  (%p3642_p3), %s3999_s15, 2048, %s3997_s9, %s4004_s4, %s3568_s30, %s3568_s30, %s3569_s16  }
 0x494 PF: > { %p3198_p1 = scmp.ge.s32.totalorder %s3561_s19, 2  ;;  %s2345_s8 = sand.u32 1, %s3533_s12  }
 0x495   : > { %s2346_s11 = scalar_lea.sflag [#allocation7], %s2345_s8 }
 0x496   : > { %p3193_p2 = pnand %p3198_p1, %p3651_p8 }
 0x498   : > { %p3194_p4 = pneg %p3193_p2 }
 0x49a   : > { %3528 = dma.done.wait (%p3194_p4), %s2346_s11, 2048  }
 0x49b   : > { %3530 = vsyncadd (%p3194_p4), %s2346_s11, 4294965248  ;;  %s17_s19 = sadd.s32 1, %s3561_s19   ;;  %s4064_s12 = smov %s3537_s13 }
 0x49c   : > { %p14_p5 = scmp.ge.s32.totalorder %s17_s19, 6   ;;  %s4065_s13 = smov %s3541_s14 }
 0x49d   : > { %s4066_s14 = smov %s3669_s5  ;;  %s4067_s15 = smov %s3553_s17 }
 0x49e   : > { %s4068_s16 = smov %s3557_s18  ;;  %s4069_s17 = smov %s4072_s22 }
 0x49f   : > { %s4070_s18 = smov %s4076_s23  ;;  %16 = sbr.rel (!%p14_p5) target bundleno = 6 (0x6), region = 81 }
 0x4a4   :  { %2351 = vsyncpa [#allocation6], 1 }
 0x4a5   :  { %2353 = vsyncpa [#allocation6 + $0x1], 1 }
 0x4a6   :  { %2354 = vsyncpa [#allocation7], 1 }
 0x4a7   :  { %2356 = vsyncpa [#allocation7 + $0x1], 1 }

</bundles_post_ra>
